<compile_context>
chip_gen: v5e
topology: v5e:2x2
jax: 0.10.0
libtpu: 0.0.40
codegen_flags: <defaults>
</compile_context>

<pallas_src>
import functools

import jax
import jax.numpy as jnp
from jax.experimental import pallas as pl
from jax.experimental.pallas import tpu as pltpu


def ecg_lstm_kernel(len_ref, gx0_ref, whh0_ref, wihr_ref, whhr_ref, br_ref,
                    wfc_ref, bfc_ref, out_ref, h_scr, c_scr, last_scr,
                    *, num_layers, hidden, tile_t, compute_dtype):
    t_idx = pl.program_id(1)
    bb = h_scr.shape[1]                                   # batch-block size
    H = hidden
    cd = compute_dtype

    @pl.when(t_idx == 0)
    def _init():
        h_scr[...] = jnp.zeros_like(h_scr)
        c_scr[...] = jnp.zeros_like(c_scr)
        last_scr[...] = jnp.zeros_like(last_scr)

    t0 = t_idx * tile_t
    len_m1 = len_ref[...] - 1                             # (bb, 1) int32

    # Layer-0 gates for the whole tile: precomputed in the wrapper (one big
    # XLA matmul, bias folded in) -> lane-dense (tile_t*bb, 4H) f32 slab.
    gx0 = gx0_ref[0, 0]

    # Hoist resident weights out of the step loops (single VMEM load each).
    whh0 = whh0_ref[...]
    wih_rest = [wihr_ref[i] for i in range(num_layers - 1)]
    whh_rest = [whhr_ref[i] for i in range(num_layers - 1)]
    b_rest = [br_ref[i] for i in range(num_layers - 1)]

    # Carried state as SSA values: load once per tile, store once per tile.
    h = [h_scr[l] for l in range(num_layers)]             # f32 (bb, H)
    c = [c_scr[l] for l in range(num_layers)]             # f32 (bb, H)
    last = last_scr[...]                                  # f32 (bb, H)

    def lstm_cell(g, c_prev):
        # i/f/o columns of g are already scaled by 0.5 (wrapper), so a single
        # tanh over the full 4H vreg yields both the sigmoid and tanh gates.
        th = jnp.tanh(g)
        sg = 0.5 * th + 0.5
        # NOTE: H=32 < 128 means these are sub-lane-width slices (XLU
        # realignment); irrelevant once H is a multiple of 128.
        i_g = sg[:, 0 * H:1 * H]
        f_g = sg[:, 1 * H:2 * H]
        g_g = th[:, 2 * H:3 * H]
        o_g = sg[:, 3 * H:4 * H]
        c_new = f_g * c_prev + i_g * g_g
        h_new = o_g * jnp.tanh(c_new)
        return h_new, c_new

    # Wavefront schedule: super-step ss runs layer l at time-step s = ss - l.
    # Every (l, s) active in one super-step is independent (pure dataflow), so
    # the scheduler can overlap MXU pushes and EUP/VPU gate chains across
    # layers.  Fully static unroll: (tile_t + L - 1) super-steps.
    for ss in range(tile_t + num_layers - 1):
        h_snap = list(h)                                  # previous super-step values
        for l in range(num_layers):
            s = ss - l
            if not (0 <= s < tile_t):
                continue
            h_prev = h_snap[l]
            if l == 0:
                g = gx0[s * bb:(s + 1) * bb, :] + jnp.dot(
                    h_prev.astype(cd), whh0,
                    preferred_element_type=jnp.float32)
            else:
                xin = h_snap[l - 1].astype(cd)            # layer l-1 hidden @ step s
                g = (jnp.dot(xin, wih_rest[l - 1],
                             preferred_element_type=jnp.float32)
                     + jnp.dot(h_prev.astype(cd), whh_rest[l - 1],
                               preferred_element_type=jnp.float32)
                     + b_rest[l - 1])
            h_new, c_new = lstm_cell(g, c[l])
            h[l] = h_new
            c[l] = c_new
            if l == num_layers - 1:
                # gather top-layer hidden state at t == lengths - 1
                last = jnp.where(len_m1 == (t0 + s), h_new, last)
        # TODO(synk): inter-layer dropout (p=0.2) omitted — eval-mode semantics.

    for l in range(num_layers):
        h_scr[l] = h[l]
        c_scr[l] = c[l]
    last_scr[...] = last

    @pl.when(t_idx == pl.num_programs(1) - 1)
    def _fc():
        # fc head: (bb, H) @ (H, C_pad) + (1, C_pad); lane-dense (128) store.
        out_ref[...] = (jnp.dot(last_scr[...].astype(cd), wfc_ref[...],
                                preferred_element_type=jnp.float32)
                        + bfc_ref[...])


def ecg_lstm_forward(x, lengths, params, *, num_layers, hidden,
                     tile_t=8, block_b=None, compute_dtype=jnp.bfloat16):
    B, T, D = x.shape
    H = hidden
    C = params["b_fc"].shape[-1]
    cd = compute_dtype

    # pack_padded_sequence requires 1 <= length <= T (host-side check only).
    try:
        lmin, lmax = int(jnp.min(lengths)), int(jnp.max(lengths))
        if lmin < 1 or lmax > T:
            raise ValueError(f"lengths must lie in [1, {T}], got [{lmin}, {lmax}]")
    except jax.errors.ConcretizationTypeError:
        pass  # traced lengths: skip host-side validation

    # Batch block: amortize MXU push latency over as many rows as the batch
    # allows (>=8 for sublane alignment, capped so VMEM stays comfortable).
    if block_b is None:
        block_b = min(256, ((B + 7) // 8) * 8)
    # Time tile: cover the whole sequence in one grid step when it is short;
    # each grid step pays ~0.35 us fixed overhead.
    tile_t = max(1, min(tile_t, T))

    B_pad = ((B + block_b - 1) // block_b) * block_b
    T_pad = ((T + tile_t - 1) // tile_t) * tile_t
    C_pad = ((C + 127) // 128) * 128
    n_b = B_pad // block_b
    n_t = T_pad // tile_t

    # Pre-scale i/f/o gate columns (and biases) by 0.5 so the kernel only
    # needs one tanh per step:  sigmoid(x) = 0.5 * (1 + tanh(x/2)).
    gate_scale = jnp.concatenate([
        jnp.full((1, H), 0.5, jnp.float32),   # i
        jnp.full((1, H), 0.5, jnp.float32),   # f
        jnp.ones((1, H), jnp.float32),        # g (true tanh gate, unscaled)
        jnp.full((1, H), 0.5, jnp.float32),   # o
    ], axis=1)

    w_ih0_s = params["w_ih0"] * gate_scale
    b0_s = (params["b0"] * gate_scale).astype(jnp.float32)
    whh0 = (params["w_hh0"] * gate_scale).astype(cd)
    wihr = (params["w_ihr"] * gate_scale[None]).astype(cd)
    whhr = (params["w_hhr"] * gate_scale[None]).astype(cd)
    br = (params["br"] * gate_scale[None]).astype(jnp.float32)
    wfc = jnp.pad(params["w_fc"], ((0, 0), (0, C_pad - C))).astype(cd)
    bfc = jnp.pad(params["b_fc"], ((0, 0), (0, C_pad - C))).astype(jnp.float32)
    Lr = wihr.shape[0]

    # Layer-0 input projection off the serial path: one big XLA matmul with
    # the bias folded in; the kernel consumes lane-dense (tile_t*bb, 4H) f32
    # gate tiles (D=16 would otherwise give a poorly-filled K=16 MXU matmul).
    x_pad = jnp.pad(x, ((0, B_pad - B), (0, T_pad - T), (0, 0)))
    gx0 = (jnp.dot(x_pad.astype(cd).reshape(B_pad * T_pad, D),
                   w_ih0_s.astype(cd), preferred_element_type=jnp.float32)
           .reshape(B_pad, T_pad, 4 * H) + b0_s)
    gx0_tiles = (gx0.transpose(1, 0, 2)                    # time-major
                    .reshape(n_t, tile_t, n_b, block_b, 4 * H)
                    .transpose(0, 2, 1, 3, 4)
                    .reshape(n_t, n_b, tile_t * block_b, 4 * H))

    len2d = jnp.pad(jnp.asarray(lengths, jnp.int32).reshape(B, 1),
                    ((0, B_pad - B), (0, 0)), constant_values=1)

    kernel = functools.partial(ecg_lstm_kernel, num_layers=num_layers,
                               hidden=hidden, tile_t=tile_t, compute_dtype=cd)

    def const(shape):
        return pl.BlockSpec(shape, lambda b, t: (0,) * len(shape))

    grid_spec = pltpu.PrefetchScalarGridSpec(
        num_scalar_prefetch=0,
        grid=(n_b, n_t),
        in_specs=[
            pl.BlockSpec((block_b, 1), lambda b, t: (b, 0)),              # lengths
            pl.BlockSpec((1, 1, tile_t * block_b, 4 * H),
                         lambda b, t: (t, b, 0, 0)),                      # gx0 tiles
            const((H, 4 * H)),                                            # w_hh0
            const((Lr, H, 4 * H)),                                        # w_ihr
            const((Lr, H, 4 * H)),                                        # w_hhr
            const((Lr, 1, 4 * H)),                                        # br
            const((H, C_pad)),                                            # w_fc
            const((1, C_pad)),                                            # b_fc
        ],
        out_specs=pl.BlockSpec((block_b, C_pad), lambda b, t: (b, 0)),
        scratch_shapes=[
            pltpu.VMEM((num_layers, block_b, H), jnp.float32),            # h carry
            pltpu.VMEM((num_layers, block_b, H), jnp.float32),            # c carry
            pltpu.VMEM((block_b, H), jnp.float32),                        # last h
        ],
    )

    # In-kernel work only (layer-0 input projection is XLA-side).
    flops = int(2 * T_pad * B_pad * H * 4 * H * (2 * num_layers - 1)
                + 2 * B_pad * H * C_pad)
    transcendentals = int(T_pad * B_pad * num_layers * 5 * H)
    args = (len2d, gx0_tiles, whh0, wihr, whhr, br, wfc, bfc)
    bytes_accessed = int(sum(a.size * a.dtype.itemsize for a in args)
                         + B_pad * C_pad * 4)

    out = pl.pallas_call(
        kernel,
        out_shape=jax.ShapeDtypeStruct((B_pad, C_pad), jnp.float32),
        grid_spec=grid_spec,
        compiler_params=pltpu.CompilerParams(
            dimension_semantics=("parallel", "arbitrary"),
            vmem_limit_bytes=32 * 1024 * 1024),
        cost_estimate=pl.CostEstimate(flops=flops,
                                      transcendentals=transcendentals,
                                      bytes_accessed=bytes_accessed),
    )(*args)
    return out[:B, :C]


def init_params(key, input_size, hidden, num_layers, num_classes):
    """PyTorch-style init: all LSTM params ~ U(-1/sqrt(H), 1/sqrt(H))."""
    bound = 1.0 / jnp.sqrt(jnp.float32(hidden))
    keys = iter(jax.random.split(key, 6 * num_layers + 4))

    def u(k, shape, b):
        return jax.random.uniform(k, shape, jnp.float32, -b, b)

    # layer 0
    w_ih0 = u(next(keys), (input_size, 4 * hidden), bound)
    w_hh0 = u(next(keys), (hidden, 4 * hidden), bound)
    b0 = (u(next(keys), (1, 4 * hidden), bound)
          + u(next(keys), (1, 4 * hidden), bound))          # b_ih + b_hh combined

    # layers 1..L-1 stacked (dummy if num_layers == 1; unused in kernel)
    n_rest = max(num_layers - 1, 1)
    w_ihr, w_hhr, br = [], [], []
    for _ in range(n_rest):
        w_ihr.append(u(next(keys), (hidden, 4 * hidden), bound))
        w_hhr.append(u(next(keys), (hidden, 4 * hidden), bound))
        br.append(u(next(keys), (1, 4 * hidden), bound)
                  + u(next(keys), (1, 4 * hidden), bound))
    w_ihr = jnp.stack(w_ihr)                                 # (L-1, H, 4H)
    w_hhr = jnp.stack(w_hhr)
    br = jnp.stack(br)                                       # (L-1, 1, 4H)

    w_fc = u(next(keys), (hidden, num_classes), bound)
    b_fc = u(next(keys), (1, num_classes), bound)

    return dict(w_ih0=w_ih0, w_hh0=w_hh0, b0=b0,
                w_ihr=w_ihr, w_hhr=w_hhr, br=br,
                w_fc=w_fc, b_fc=b_fc)


def reference_forward(x, lengths, params, *, num_layers, hidden,
                      compute_dtype=jnp.bfloat16):
    """Pure-JAX reference matching the PyTorch forward (eval mode), using the
    same bf16-operand / f32-accumulate matmul precision as the kernel."""
    B, T, D = x.shape
    cd = compute_dtype
    h = [jnp.zeros((B, hidden), jnp.float32) for _ in range(num_layers)]
    c = [jnp.zeros((B, hidden), jnp.float32) for _ in range(num_layers)]
    tops = []
    for t in range(T):
        inp = x[:, t, :]
        for l in range(num_layers):
            if l == 0:
                wih, whh, b = params["w_ih0"], params["w_hh0"], params["b0"]
            else:
                wih, whh, b = (params["w_ihr"][l - 1],
                               params["w_hhr"][l - 1], params["br"][l - 1])
            gates = (jnp.dot(inp.astype(cd), wih.astype(cd),
                             preferred_element_type=jnp.float32)
                     + jnp.dot(h[l].astype(cd), whh.astype(cd),
                               preferred_element_type=jnp.float32)
                     + b)
            i = jax.nn.sigmoid(gates[:, 0 * hidden:1 * hidden])
            f = jax.nn.sigmoid(gates[:, 1 * hidden:2 * hidden])
            g = jnp.tanh(gates[:, 2 * hidden:3 * hidden])
            o = jax.nn.sigmoid(gates[:, 3 * hidden:4 * hidden])
            c[l] = f * c[l] + i * g
            h[l] = o * jnp.tanh(c[l])
            inp = h[l]
        tops.append(inp)
    out_seq = jnp.stack(tops, axis=1)                        # (B, T, H)
    last = out_seq[jnp.arange(B), lengths - 1, :]
    return (jnp.dot(last.astype(cd), params["w_fc"].astype(cd),
                    preferred_element_type=jnp.float32)
            + params["b_fc"])


if __name__ == "__main__":
    INPUT_SIZE = 16
    HIDDEN = 32
    NUM_LAYERS = 2
    NUM_CLASSES = 8
    B, T = 4, 8

    key = jax.random.PRNGKey(0)
    kx, kp = jax.random.split(key)
    x = jax.random.normal(kx, (B, T, INPUT_SIZE), jnp.float32)
    lengths = jnp.array([8, 5, 7, 3], dtype=jnp.int32)

    params = init_params(kp, INPUT_SIZE, HIDDEN, NUM_LAYERS, NUM_CLASSES)

    out = ecg_lstm_forward(x, lengths, params,
                           num_layers=NUM_LAYERS, hidden=HIDDEN)
    out = jax.block_until_ready(out)

    ref = reference_forward(x, lengths, params,
                            num_layers=NUM_LAYERS, hidden=HIDDEN)
    assert out.shape == (B, NUM_CLASSES)
    assert jnp.allclose(out, ref, atol=1e-2, rtol=1e-2), float(
        jnp.max(jnp.abs(out - ref)))

    print("KERNEL_OK")
</pallas_src>

<mosaic_0001>
module attributes {stable_mosaic.version = 11 : i64} {
  func.func @ecg_lstm_kernel(%arg0: i32, %arg1: i32, %arg2: memref<8x1xi32, #tpu.memory_space<vmem>>, %arg3: memref<1x1x64x128xf32, #tpu.memory_space<vmem>>, %arg4: memref<32x128xbf16, #tpu.memory_space<vmem>>, %arg5: memref<1x32x128xbf16, #tpu.memory_space<vmem>>, %arg6: memref<1x32x128xbf16, #tpu.memory_space<vmem>>, %arg7: memref<1x1x128xf32, #tpu.memory_space<vmem>>, %arg8: memref<32x128xbf16, #tpu.memory_space<vmem>>, %arg9: memref<1x128xf32, #tpu.memory_space<vmem>>, %arg10: memref<8x128xf32, #tpu.memory_space<vmem>>, %arg11: memref<2x8x32xf32, #tpu.memory_space<vmem>>, %arg12: memref<2x8x32xf32, #tpu.memory_space<vmem>>, %arg13: memref<8x32xf32, #tpu.memory_space<vmem>>) attributes {dimension_semantics = [#tpu.dimension_semantics<parallel>, #tpu.dimension_semantics<arbitrary>], iteration_bounds = array<i64: 1, 1>, scalar_prefetch = 0 : i64, scratch_operands = 3 : i64, tpu.core_type = #tpu.core_type<tc>, window_params = [{transform_indices = @transform_0, window_bounds = array<i64: 8, 1>}, {transform_indices = @transform_1, window_bounds = array<i64: 1, 1, 64, 128>}, {pipeline_mode = #tpu.pipeline_mode<synchronous>, transform_indices = @transform_2, window_bounds = array<i64: 32, 128>}, {pipeline_mode = #tpu.pipeline_mode<synchronous>, transform_indices = @transform_3, window_bounds = array<i64: 1, 32, 128>}, {pipeline_mode = #tpu.pipeline_mode<synchronous>, transform_indices = @transform_4, window_bounds = array<i64: 1, 32, 128>}, {pipeline_mode = #tpu.pipeline_mode<synchronous>, transform_indices = @transform_5, window_bounds = array<i64: 1, 1, 128>}, {pipeline_mode = #tpu.pipeline_mode<synchronous>, transform_indices = @transform_6, window_bounds = array<i64: 32, 128>}, {pipeline_mode = #tpu.pipeline_mode<synchronous>, transform_indices = @transform_7, window_bounds = array<i64: 1, 128>}, {transform_indices = @transform_8, window_bounds = array<i64: 8, 128>}]} {
    %c0_i32 = arith.constant 0 : i32
    %0 = arith.cmpi eq, %arg1, %c0_i32 : i32
    %1 = arith.extui %0 : i1 to i32
    %c0_i32_0 = arith.constant 0 : i32
    %2 = arith.cmpi ne, %1, %c0_i32_0 : i32
    scf.if %2 {
      %cst_103 = arith.constant 0.000000e+00 : f32
      %401 = vector.broadcast %cst_103 : f32 to vector<2x8x32xf32>
      %c0_104 = arith.constant 0 : index
      %c0_105 = arith.constant 0 : index
      %c0_106 = arith.constant 0 : index
      %402 = vector.load %arg11[%c0_104, %c0_105, %c0_106] : memref<2x8x32xf32, #tpu.memory_space<vmem>>, vector<2x8x32xf32>
      tpu.vector_store %arg11[%c0_104, %c0_105, %c0_106], %401 {strides = array<i32>} : memref<2x8x32xf32, #tpu.memory_space<vmem>>, vector<2x8x32xf32>,
      %cst_107 = arith.constant 0.000000e+00 : f32
      %403 = vector.broadcast %cst_107 : f32 to vector<2x8x32xf32>
      %c0_108 = arith.constant 0 : index
      %c0_109 = arith.constant 0 : index
      %c0_110 = arith.constant 0 : index
      %404 = vector.load %arg12[%c0_108, %c0_109, %c0_110] : memref<2x8x32xf32, #tpu.memory_space<vmem>>, vector<2x8x32xf32>
      tpu.vector_store %arg12[%c0_108, %c0_109, %c0_110], %403 {strides = array<i32>} : memref<2x8x32xf32, #tpu.memory_space<vmem>>, vector<2x8x32xf32>,
      %cst_111 = arith.constant 0.000000e+00 : f32
      %405 = vector.broadcast %cst_111 : f32 to vector<8x32xf32>
      %c0_112 = arith.constant 0 : index
      %c0_113 = arith.constant 0 : index
      %406 = vector.load %arg13[%c0_112, %c0_113] : memref<8x32xf32, #tpu.memory_space<vmem>>, vector<8x32xf32>
      tpu.vector_store %arg13[%c0_112, %c0_113], %405 {strides = array<i32>} : memref<8x32xf32, #tpu.memory_space<vmem>>, vector<8x32xf32>,
    } else {
    }
    %c8_i32 = arith.constant 8 : i32
    %3 = arith.muli %arg1, %c8_i32 : i32
    %c0 = arith.constant 0 : index
    %c0_1 = arith.constant 0 : index
    %4 = vector.load %arg2[%c0, %c0_1] : memref<8x1xi32, #tpu.memory_space<vmem>>, vector<8x1xi32>
    %c1_i32 = arith.constant 1 : i32
    %5 = vector.broadcast %c1_i32 : i32 to vector<8x1xi32>
    %6 = arith.subi %4, %5 : vector<8x1xi32>
    %c0_2 = arith.constant 0 : index
    %c0_3 = arith.constant 0 : index
    %c0_4 = arith.constant 0 : index
    %c0_5 = arith.constant 0 : index
    %7 = vector.load %arg3[%c0_2, %c0_3, %c0_4, %c0_5] : memref<1x1x64x128xf32, #tpu.memory_space<vmem>>, vector<1x1x64x128xf32>
    %8 = vector.shape_cast %7 : vector<1x1x64x128xf32> to vector<64x128xf32>
    %c0_6 = arith.constant 0 : index
    %c0_7 = arith.constant 0 : index
    %9 = vector.load %arg4[%c0_6, %c0_7] : memref<32x128xbf16, #tpu.memory_space<vmem>>, vector<32x128xbf16>
    %c0_8 = arith.constant 0 : index
    %c0_9 = arith.constant 0 : index
    %c0_10 = arith.constant 0 : index
    %10 = vector.load %arg5[%c0_8, %c0_9, %c0_10] : memref<1x32x128xbf16, #tpu.memory_space<vmem>>, vector<1x32x128xbf16>
    %11 = vector.shape_cast %10 : vector<1x32x128xbf16> to vector<32x128xbf16>
    %c0_11 = arith.constant 0 : index
    %c0_12 = arith.constant 0 : index
    %c0_13 = arith.constant 0 : index
    %12 = vector.load %arg6[%c0_11, %c0_12, %c0_13] : memref<1x32x128xbf16, #tpu.memory_space<vmem>>, vector<1x32x128xbf16>
    %13 = vector.shape_cast %12 : vector<1x32x128xbf16> to vector<32x128xbf16>
    %c0_14 = arith.constant 0 : index
    %c0_15 = arith.constant 0 : index
    %c0_16 = arith.constant 0 : index
    %14 = vector.load %arg7[%c0_14, %c0_15, %c0_16] : memref<1x1x128xf32, #tpu.memory_space<vmem>>, vector<1x1x128xf32>
    %15 = vector.shape_cast %14 : vector<1x1x128xf32> to vector<1x128xf32>
    %c0_17 = arith.constant 0 : index
    %c0_18 = arith.constant 0 : index
    %c0_19 = arith.constant 0 : index
    %16 = vector.load %arg11[%c0_17, %c0_18, %c0_19] : memref<2x8x32xf32, #tpu.memory_space<vmem>>, vector<1x8x32xf32>
    %17 = vector.shape_cast %16 : vector<1x8x32xf32> to vector<8x32xf32>
    %c1 = arith.constant 1 : index
    %c0_20 = arith.constant 0 : index
    %c0_21 = arith.constant 0 : index
    %18 = vector.load %arg11[%c1, %c0_20, %c0_21] : memref<2x8x32xf32, #tpu.memory_space<vmem>>, vector<1x8x32xf32>
    %19 = vector.shape_cast %18 : vector<1x8x32xf32> to vector<8x32xf32>
    %c0_22 = arith.constant 0 : index
    %c0_23 = arith.constant 0 : index
    %c0_24 = arith.constant 0 : index
    %20 = vector.load %arg12[%c0_22, %c0_23, %c0_24] : memref<2x8x32xf32, #tpu.memory_space<vmem>>, vector<1x8x32xf32>
    %21 = vector.shape_cast %20 : vector<1x8x32xf32> to vector<8x32xf32>
    %c1_25 = arith.constant 1 : index
    %c0_26 = arith.constant 0 : index
    %c0_27 = arith.constant 0 : index
    %22 = vector.load %arg12[%c1_25, %c0_26, %c0_27] : memref<2x8x32xf32, #tpu.memory_space<vmem>>, vector<1x8x32xf32>
    %23 = vector.shape_cast %22 : vector<1x8x32xf32> to vector<8x32xf32>
    %c0_28 = arith.constant 0 : index
    %c0_29 = arith.constant 0 : index
    %24 = vector.load %arg13[%c0_28, %c0_29] : memref<8x32xf32, #tpu.memory_space<vmem>>, vector<8x32xf32>
    %25 = vector.extract_strided_slice %8 {offsets = [0, 0], sizes = [8, 128], strides = [1, 1]} : vector<64x128xf32> to vector<8x128xf32>
    %26 = arith.truncf %17 : vector<8x32xf32> to vector<8x32xbf16>
    %cst = arith.constant dense<0.000000e+00> : vector<8x128xf32>
    %27 = tpu.matmul %26, %9, %cst {dimension_numbers = #tpu.dot_dimension_numbers<[1], [0], [0], [1], [0, 0, 1, 1], [], []>} : vector<8x32xbf16>, vector<32x128xbf16>, vector<8x128xf32> -> vector<8x128xf32>
    %28 = arith.addf %25, %27 : vector<8x128xf32>
    %29 = math.tanh %28 : vector<8x128xf32>
    %cst_30 = arith.constant 5.000000e-01 : f32
    %30 = vector.broadcast %cst_30 : f32 to vector<8x128xf32>
    %31 = arith.mulf %30, %29 : vector<8x128xf32>
    %cst_31 = arith.constant 5.000000e-01 : f32
    %32 = vector.broadcast %cst_31 : f32 to vector<8x128xf32>
    %33 = arith.addf %31, %32 : vector<8x128xf32>
    %34 = vector.extract_strided_slice %33 {offsets = [0, 0], sizes = [8, 32], strides = [1, 1]} : vector<8x128xf32> to vector<8x32xf32>
    %35 = vector.extract_strided_slice %33 {offsets = [0, 32], sizes = [8, 32], strides = [1, 1]} : vector<8x128xf32> to vector<8x32xf32>
    %36 = vector.extract_strided_slice %29 {offsets = [0, 64], sizes = [8, 32], strides = [1, 1]} : vector<8x128xf32> to vector<8x32xf32>
    %37 = vector.extract_strided_slice %33 {offsets = [0, 96], sizes = [8, 32], strides = [1, 1]} : vector<8x128xf32> to vector<8x32xf32>
    %38 = arith.mulf %35, %21 : vector<8x32xf32>
    %39 = arith.mulf %34, %36 : vector<8x32xf32>
    %40 = arith.addf %38, %39 : vector<8x32xf32>
    %41 = math.tanh %40 : vector<8x32xf32>
    %42 = arith.mulf %37, %41 : vector<8x32xf32>
    %43 = vector.extract_strided_slice %8 {offsets = [8, 0], sizes = [8, 128], strides = [1, 1]} : vector<64x128xf32> to vector<8x128xf32>
    %44 = arith.truncf %42 : vector<8x32xf32> to vector<8x32xbf16>
    %cst_32 = arith.constant dense<0.000000e+00> : vector<8x128xf32>
    %45 = tpu.matmul %44, %9, %cst_32 {dimension_numbers = #tpu.dot_dimension_numbers<[1], [0], [0], [1], [0, 0, 1, 1], [], []>} : vector<8x32xbf16>, vector<32x128xbf16>, vector<8x128xf32> -> vector<8x128xf32>
    %46 = arith.addf %43, %45 : vector<8x128xf32>
    %47 = math.tanh %46 : vector<8x128xf32>
    %cst_33 = arith.constant 5.000000e-01 : f32
    %48 = vector.broadcast %cst_33 : f32 to vector<8x128xf32>
    %49 = arith.mulf %48, %47 : vector<8x128xf32>
    %cst_34 = arith.constant 5.000000e-01 : f32
    %50 = vector.broadcast %cst_34 : f32 to vector<8x128xf32>
    %51 = arith.addf %49, %50 : vector<8x128xf32>
    %52 = vector.extract_strided_slice %51 {offsets = [0, 0], sizes = [8, 32], strides = [1, 1]} : vector<8x128xf32> to vector<8x32xf32>
    %53 = vector.extract_strided_slice %51 {offsets = [0, 32], sizes = [8, 32], strides = [1, 1]} : vector<8x128xf32> to vector<8x32xf32>
    %54 = vector.extract_strided_slice %47 {offsets = [0, 64], sizes = [8, 32], strides = [1, 1]} : vector<8x128xf32> to vector<8x32xf32>
    %55 = vector.extract_strided_slice %51 {offsets = [0, 96], sizes = [8, 32], strides = [1, 1]} : vector<8x128xf32> to vector<8x32xf32>
    %56 = arith.mulf %53, %40 : vector<8x32xf32>
    %57 = arith.mulf %52, %54 : vector<8x32xf32>
    %58 = arith.addf %56, %57 : vector<8x32xf32>
    %59 = math.tanh %58 : vector<8x32xf32>
    %60 = arith.mulf %55, %59 : vector<8x32xf32>
    %61 = arith.truncf %42 : vector<8x32xf32> to vector<8x32xbf16>
    %cst_35 = arith.constant dense<0.000000e+00> : vector<8x128xf32>
    %62 = tpu.matmul %61, %11, %cst_35 {dimension_numbers = #tpu.dot_dimension_numbers<[1], [0], [0], [1], [0, 0, 1, 1], [], []>} : vector<8x32xbf16>, vector<32x128xbf16>, vector<8x128xf32> -> vector<8x128xf32>
    %63 = arith.truncf %19 : vector<8x32xf32> to vector<8x32xbf16>
    %cst_36 = arith.constant dense<0.000000e+00> : vector<8x128xf32>
    %64 = tpu.matmul %63, %13, %cst_36 {dimension_numbers = #tpu.dot_dimension_numbers<[1], [0], [0], [1], [0, 0, 1, 1], [], []>} : vector<8x32xbf16>, vector<32x128xbf16>, vector<8x128xf32> -> vector<8x128xf32>
    %65 = arith.addf %62, %64 : vector<8x128xf32>
    %66 = vector.broadcast %15 : vector<1x128xf32> to vector<8x128xf32>
    %67 = arith.addf %65, %66 : vector<8x128xf32>
    %68 = math.tanh %67 : vector<8x128xf32>
    %cst_37 = arith.constant 5.000000e-01 : f32
    %69 = vector.broadcast %cst_37 : f32 to vector<8x128xf32>
    %70 = arith.mulf %69, %68 : vector<8x128xf32>
    %cst_38 = arith.constant 5.000000e-01 : f32
    %71 = vector.broadcast %cst_38 : f32 to vector<8x128xf32>
    %72 = arith.addf %70, %71 : vector<8x128xf32>
    %73 = vector.extract_strided_slice %72 {offsets = [0, 0], sizes = [8, 32], strides = [1, 1]} : vector<8x128xf32> to vector<8x32xf32>
    %74 = vector.extract_strided_slice %72 {offsets = [0, 32], sizes = [8, 32], strides = [1, 1]} : vector<8x128xf32> to vector<8x32xf32>
    %75 = vector.extract_strided_slice %68 {offsets = [0, 64], sizes = [8, 32], strides = [1, 1]} : vector<8x128xf32> to vector<8x32xf32>
    %76 = vector.extract_strided_slice %72 {offsets = [0, 96], sizes = [8, 32], strides = [1, 1]} : vector<8x128xf32> to vector<8x32xf32>
    %77 = arith.mulf %74, %23 : vector<8x32xf32>
    %78 = arith.mulf %73, %75 : vector<8x32xf32>
    %79 = arith.addf %77, %78 : vector<8x32xf32>
    %80 = math.tanh %79 : vector<8x32xf32>
    %81 = arith.mulf %76, %80 : vector<8x32xf32>
    %c0_i32_39 = arith.constant 0 : i32
    %82 = arith.addi %3, %c0_i32_39 : i32
    %83 = vector.broadcast %82 : i32 to vector<8x1xi32>
    %84 = arith.cmpi eq, %6, %83 : vector<8x1xi32>
    %85 = vector.shape_cast %84 : vector<8x1xi1> to vector<8x1xi1>
    %86 = vector.broadcast %85 : vector<8x1xi1> to vector<8x32xi1>
    %87 = arith.select %86, %81, %24 : vector<8x32xi1>, vector<8x32xf32>
    %88 = vector.extract_strided_slice %8 {offsets = [16, 0], sizes = [8, 128], strides = [1, 1]} : vector<64x128xf32> to vector<8x128xf32>
    %89 = arith.truncf %60 : vector<8x32xf32> to vector<8x32xbf16>
    %cst_40 = arith.constant dense<0.000000e+00> : vector<8x128xf32>
    %90 = tpu.matmul %89, %9, %cst_40 {dimension_numbers = #tpu.dot_dimension_numbers<[1], [0], [0], [1], [0, 0, 1, 1], [], []>} : vector<8x32xbf16>, vector<32x128xbf16>, vector<8x128xf32> -> vector<8x128xf32>
    %91 = arith.addf %88, %90 : vector<8x128xf32>
    %92 = math.tanh %91 : vector<8x128xf32>
    %cst_41 = arith.constant 5.000000e-01 : f32
    %93 = vector.broadcast %cst_41 : f32 to vector<8x128xf32>
    %94 = arith.mulf %93, %92 : vector<8x128xf32>
    %cst_42 = arith.constant 5.000000e-01 : f32
    %95 = vector.broadcast %cst_42 : f32 to vector<8x128xf32>
    %96 = arith.addf %94, %95 : vector<8x128xf32>
    %97 = vector.extract_strided_slice %96 {offsets = [0, 0], sizes = [8, 32], strides = [1, 1]} : vector<8x128xf32> to vector<8x32xf32>
    %98 = vector.extract_strided_slice %96 {offsets = [0, 32], sizes = [8, 32], strides = [1, 1]} : vector<8x128xf32> to vector<8x32xf32>
    %99 = vector.extract_strided_slice %92 {offsets = [0, 64], sizes = [8, 32], strides = [1, 1]} : vector<8x128xf32> to vector<8x32xf32>
    %100 = vector.extract_strided_slice %96 {offsets = [0, 96], sizes = [8, 32], strides = [1, 1]} : vector<8x128xf32> to vector<8x32xf32>
    %101 = arith.mulf %98, %58 : vector<8x32xf32>
    %102 = arith.mulf %97, %99 : vector<8x32xf32>
    %103 = arith.addf %101, %102 : vector<8x32xf32>
    %104 = math.tanh %103 : vector<8x32xf32>
    %105 = arith.mulf %100, %104 : vector<8x32xf32>
    %106 = arith.truncf %60 : vector<8x32xf32> to vector<8x32xbf16>
    %cst_43 = arith.constant dense<0.000000e+00> : vector<8x128xf32>
    %107 = tpu.matmul %106, %11, %cst_43 {dimension_numbers = #tpu.dot_dimension_numbers<[1], [0], [0], [1], [0, 0, 1, 1], [], []>} : vector<8x32xbf16>, vector<32x128xbf16>, vector<8x128xf32> -> vector<8x128xf32>
    %108 = arith.truncf %81 : vector<8x32xf32> to vector<8x32xbf16>
    %cst_44 = arith.constant dense<0.000000e+00> : vector<8x128xf32>
    %109 = tpu.matmul %108, %13, %cst_44 {dimension_numbers = #tpu.dot_dimension_numbers<[1], [0], [0], [1], [0, 0, 1, 1], [], []>} : vector<8x32xbf16>, vector<32x128xbf16>, vector<8x128xf32> -> vector<8x128xf32>
    %110 = arith.addf %107, %109 : vector<8x128xf32>
    %111 = vector.broadcast %15 : vector<1x128xf32> to vector<8x128xf32>
    %112 = arith.addf %110, %111 : vector<8x128xf32>
    %113 = math.tanh %112 : vector<8x128xf32>
    %cst_45 = arith.constant 5.000000e-01 : f32
    %114 = vector.broadcast %cst_45 : f32 to vector<8x128xf32>
    %115 = arith.mulf %114, %113 : vector<8x128xf32>
    %cst_46 = arith.constant 5.000000e-01 : f32
    %116 = vector.broadcast %cst_46 : f32 to vector<8x128xf32>
    %117 = arith.addf %115, %116 : vector<8x128xf32>
    %118 = vector.extract_strided_slice %117 {offsets = [0, 0], sizes = [8, 32], strides = [1, 1]} : vector<8x128xf32> to vector<8x32xf32>
    %119 = vector.extract_strided_slice %117 {offsets = [0, 32], sizes = [8, 32], strides = [1, 1]} : vector<8x128xf32> to vector<8x32xf32>
    %120 = vector.extract_strided_slice %113 {offsets = [0, 64], sizes = [8, 32], strides = [1, 1]} : vector<8x128xf32> to vector<8x32xf32>
    %121 = vector.extract_strided_slice %117 {offsets = [0, 96], sizes = [8, 32], strides = [1, 1]} : vector<8x128xf32> to vector<8x32xf32>
    %122 = arith.mulf %119, %79 : vector<8x32xf32>
    %123 = arith.mulf %118, %120 : vector<8x32xf32>
    %124 = arith.addf %122, %123 : vector<8x32xf32>
    %125 = math.tanh %124 : vector<8x32xf32>
    %126 = arith.mulf %121, %125 : vector<8x32xf32>
    %c1_i32_47 = arith.constant 1 : i32
    %127 = arith.addi %3, %c1_i32_47 : i32
    %128 = vector.broadcast %127 : i32 to vector<8x1xi32>
    %129 = arith.cmpi eq, %6, %128 : vector<8x1xi32>
    %130 = vector.shape_cast %129 : vector<8x1xi1> to vector<8x1xi1>
    %131 = vector.broadcast %130 : vector<8x1xi1> to vector<8x32xi1>
    %132 = arith.select %131, %126, %87 : vector<8x32xi1>, vector<8x32xf32>
    %133 = vector.extract_strided_slice %8 {offsets = [24, 0], sizes = [8, 128], strides = [1, 1]} : vector<64x128xf32> to vector<8x128xf32>
    %134 = arith.truncf %105 : vector<8x32xf32> to vector<8x32xbf16>
    %cst_48 = arith.constant dense<0.000000e+00> : vector<8x128xf32>
    %135 = tpu.matmul %134, %9, %cst_48 {dimension_numbers = #tpu.dot_dimension_numbers<[1], [0], [0], [1], [0, 0, 1, 1], [], []>} : vector<8x32xbf16>, vector<32x128xbf16>, vector<8x128xf32> -> vector<8x128xf32>
    %136 = arith.addf %133, %135 : vector<8x128xf32>
    %137 = math.tanh %136 : vector<8x128xf32>
    %cst_49 = arith.constant 5.000000e-01 : f32
    %138 = vector.broadcast %cst_49 : f32 to vector<8x128xf32>
    %139 = arith.mulf %138, %137 : vector<8x128xf32>
    %cst_50 = arith.constant 5.000000e-01 : f32
    %140 = vector.broadcast %cst_50 : f32 to vector<8x128xf32>
    %141 = arith.addf %139, %140 : vector<8x128xf32>
    %142 = vector.extract_strided_slice %141 {offsets = [0, 0], sizes = [8, 32], strides = [1, 1]} : vector<8x128xf32> to vector<8x32xf32>
    %143 = vector.extract_strided_slice %141 {offsets = [0, 32], sizes = [8, 32], strides = [1, 1]} : vector<8x128xf32> to vector<8x32xf32>
    %144 = vector.extract_strided_slice %137 {offsets = [0, 64], sizes = [8, 32], strides = [1, 1]} : vector<8x128xf32> to vector<8x32xf32>
    %145 = vector.extract_strided_slice %141 {offsets = [0, 96], sizes = [8, 32], strides = [1, 1]} : vector<8x128xf32> to vector<8x32xf32>
    %146 = arith.mulf %143, %103 : vector<8x32xf32>
    %147 = arith.mulf %142, %144 : vector<8x32xf32>
    %148 = arith.addf %146, %147 : vector<8x32xf32>
    %149 = math.tanh %148 : vector<8x32xf32>
    %150 = arith.mulf %145, %149 : vector<8x32xf32>
    %151 = arith.truncf %105 : vector<8x32xf32> to vector<8x32xbf16>
    %cst_51 = arith.constant dense<0.000000e+00> : vector<8x128xf32>
    %152 = tpu.matmul %151, %11, %cst_51 {dimension_numbers = #tpu.dot_dimension_numbers<[1], [0], [0], [1], [0, 0, 1, 1], [], []>} : vector<8x32xbf16>, vector<32x128xbf16>, vector<8x128xf32> -> vector<8x128xf32>
    %153 = arith.truncf %126 : vector<8x32xf32> to vector<8x32xbf16>
    %cst_52 = arith.constant dense<0.000000e+00> : vector<8x128xf32>
    %154 = tpu.matmul %153, %13, %cst_52 {dimension_numbers = #tpu.dot_dimension_numbers<[1], [0], [0], [1], [0, 0, 1, 1], [], []>} : vector<8x32xbf16>, vector<32x128xbf16>, vector<8x128xf32> -> vector<8x128xf32>
    %155 = arith.addf %152, %154 : vector<8x128xf32>
    %156 = vector.broadcast %15 : vector<1x128xf32> to vector<8x128xf32>
    %157 = arith.addf %155, %156 : vector<8x128xf32>
    %158 = math.tanh %157 : vector<8x128xf32>
    %cst_53 = arith.constant 5.000000e-01 : f32
    %159 = vector.broadcast %cst_53 : f32 to vector<8x128xf32>
    %160 = arith.mulf %159, %158 : vector<8x128xf32>
    %cst_54 = arith.constant 5.000000e-01 : f32
    %161 = vector.broadcast %cst_54 : f32 to vector<8x128xf32>
    %162 = arith.addf %160, %161 : vector<8x128xf32>
    %163 = vector.extract_strided_slice %162 {offsets = [0, 0], sizes = [8, 32], strides = [1, 1]} : vector<8x128xf32> to vector<8x32xf32>
    %164 = vector.extract_strided_slice %162 {offsets = [0, 32], sizes = [8, 32], strides = [1, 1]} : vector<8x128xf32> to vector<8x32xf32>
    %165 = vector.extract_strided_slice %158 {offsets = [0, 64], sizes = [8, 32], strides = [1, 1]} : vector<8x128xf32> to vector<8x32xf32>
    %166 = vector.extract_strided_slice %162 {offsets = [0, 96], sizes = [8, 32], strides = [1, 1]} : vector<8x128xf32> to vector<8x32xf32>
    %167 = arith.mulf %164, %124 : vector<8x32xf32>
    %168 = arith.mulf %163, %165 : vector<8x32xf32>
    %169 = arith.addf %167, %168 : vector<8x32xf32>
    %170 = math.tanh %169 : vector<8x32xf32>
    %171 = arith.mulf %166, %170 : vector<8x32xf32>
    %c2_i32 = arith.constant 2 : i32
    %172 = arith.addi %3, %c2_i32 : i32
    %173 = vector.broadcast %172 : i32 to vector<8x1xi32>
    %174 = arith.cmpi eq, %6, %173 : vector<8x1xi32>
    %175 = vector.shape_cast %174 : vector<8x1xi1> to vector<8x1xi1>
    %176 = vector.broadcast %175 : vector<8x1xi1> to vector<8x32xi1>
    %177 = arith.select %176, %171, %132 : vector<8x32xi1>, vector<8x32xf32>
    %178 = vector.extract_strided_slice %8 {offsets = [32, 0], sizes = [8, 128], strides = [1, 1]} : vector<64x128xf32> to vector<8x128xf32>
    %179 = arith.truncf %150 : vector<8x32xf32> to vector<8x32xbf16>
    %cst_55 = arith.constant dense<0.000000e+00> : vector<8x128xf32>
    %180 = tpu.matmul %179, %9, %cst_55 {dimension_numbers = #tpu.dot_dimension_numbers<[1], [0], [0], [1], [0, 0, 1, 1], [], []>} : vector<8x32xbf16>, vector<32x128xbf16>, vector<8x128xf32> -> vector<8x128xf32>
    %181 = arith.addf %178, %180 : vector<8x128xf32>
    %182 = math.tanh %181 : vector<8x128xf32>
    %cst_56 = arith.constant 5.000000e-01 : f32
    %183 = vector.broadcast %cst_56 : f32 to vector<8x128xf32>
    %184 = arith.mulf %183, %182 : vector<8x128xf32>
    %cst_57 = arith.constant 5.000000e-01 : f32
    %185 = vector.broadcast %cst_57 : f32 to vector<8x128xf32>
    %186 = arith.addf %184, %185 : vector<8x128xf32>
    %187 = vector.extract_strided_slice %186 {offsets = [0, 0], sizes = [8, 32], strides = [1, 1]} : vector<8x128xf32> to vector<8x32xf32>
    %188 = vector.extract_strided_slice %186 {offsets = [0, 32], sizes = [8, 32], strides = [1, 1]} : vector<8x128xf32> to vector<8x32xf32>
    %189 = vector.extract_strided_slice %182 {offsets = [0, 64], sizes = [8, 32], strides = [1, 1]} : vector<8x128xf32> to vector<8x32xf32>
    %190 = vector.extract_strided_slice %186 {offsets = [0, 96], sizes = [8, 32], strides = [1, 1]} : vector<8x128xf32> to vector<8x32xf32>
    %191 = arith.mulf %188, %148 : vector<8x32xf32>
    %192 = arith.mulf %187, %189 : vector<8x32xf32>
    %193 = arith.addf %191, %192 : vector<8x32xf32>
    %194 = math.tanh %193 : vector<8x32xf32>
    %195 = arith.mulf %190, %194 : vector<8x32xf32>
    %196 = arith.truncf %150 : vector<8x32xf32> to vector<8x32xbf16>
    %cst_58 = arith.constant dense<0.000000e+00> : vector<8x128xf32>
    %197 = tpu.matmul %196, %11, %cst_58 {dimension_numbers = #tpu.dot_dimension_numbers<[1], [0], [0], [1], [0, 0, 1, 1], [], []>} : vector<8x32xbf16>, vector<32x128xbf16>, vector<8x128xf32> -> vector<8x128xf32>
    %198 = arith.truncf %171 : vector<8x32xf32> to vector<8x32xbf16>
    %cst_59 = arith.constant dense<0.000000e+00> : vector<8x128xf32>
    %199 = tpu.matmul %198, %13, %cst_59 {dimension_numbers = #tpu.dot_dimension_numbers<[1], [0], [0], [1], [0, 0, 1, 1], [], []>} : vector<8x32xbf16>, vector<32x128xbf16>, vector<8x128xf32> -> vector<8x128xf32>
    %200 = arith.addf %197, %199 : vector<8x128xf32>
    %201 = vector.broadcast %15 : vector<1x128xf32> to vector<8x128xf32>
    %202 = arith.addf %200, %201 : vector<8x128xf32>
    %203 = math.tanh %202 : vector<8x128xf32>
    %cst_60 = arith.constant 5.000000e-01 : f32
    %204 = vector.broadcast %cst_60 : f32 to vector<8x128xf32>
    %205 = arith.mulf %204, %203 : vector<8x128xf32>
    %cst_61 = arith.constant 5.000000e-01 : f32
    %206 = vector.broadcast %cst_61 : f32 to vector<8x128xf32>
    %207 = arith.addf %205, %206 : vector<8x128xf32>
    %208 = vector.extract_strided_slice %207 {offsets = [0, 0], sizes = [8, 32], strides = [1, 1]} : vector<8x128xf32> to vector<8x32xf32>
    %209 = vector.extract_strided_slice %207 {offsets = [0, 32], sizes = [8, 32], strides = [1, 1]} : vector<8x128xf32> to vector<8x32xf32>
    %210 = vector.extract_strided_slice %203 {offsets = [0, 64], sizes = [8, 32], strides = [1, 1]} : vector<8x128xf32> to vector<8x32xf32>
    %211 = vector.extract_strided_slice %207 {offsets = [0, 96], sizes = [8, 32], strides = [1, 1]} : vector<8x128xf32> to vector<8x32xf32>
    %212 = arith.mulf %209, %169 : vector<8x32xf32>
    %213 = arith.mulf %208, %210 : vector<8x32xf32>
    %214 = arith.addf %212, %213 : vector<8x32xf32>
    %215 = math.tanh %214 : vector<8x32xf32>
    %216 = arith.mulf %211, %215 : vector<8x32xf32>
    %c3_i32 = arith.constant 3 : i32
    %217 = arith.addi %3, %c3_i32 : i32
    %218 = vector.broadcast %217 : i32 to vector<8x1xi32>
    %219 = arith.cmpi eq, %6, %218 : vector<8x1xi32>
    %220 = vector.shape_cast %219 : vector<8x1xi1> to vector<8x1xi1>
    %221 = vector.broadcast %220 : vector<8x1xi1> to vector<8x32xi1>
    %222 = arith.select %221, %216, %177 : vector<8x32xi1>, vector<8x32xf32>
    %223 = vector.extract_strided_slice %8 {offsets = [40, 0], sizes = [8, 128], strides = [1, 1]} : vector<64x128xf32> to vector<8x128xf32>
    %224 = arith.truncf %195 : vector<8x32xf32> to vector<8x32xbf16>
    %cst_62 = arith.constant dense<0.000000e+00> : vector<8x128xf32>
    %225 = tpu.matmul %224, %9, %cst_62 {dimension_numbers = #tpu.dot_dimension_numbers<[1], [0], [0], [1], [0, 0, 1, 1], [], []>} : vector<8x32xbf16>, vector<32x128xbf16>, vector<8x128xf32> -> vector<8x128xf32>
    %226 = arith.addf %223, %225 : vector<8x128xf32>
    %227 = math.tanh %226 : vector<8x128xf32>
    %cst_63 = arith.constant 5.000000e-01 : f32
    %228 = vector.broadcast %cst_63 : f32 to vector<8x128xf32>
    %229 = arith.mulf %228, %227 : vector<8x128xf32>
    %cst_64 = arith.constant 5.000000e-01 : f32
    %230 = vector.broadcast %cst_64 : f32 to vector<8x128xf32>
    %231 = arith.addf %229, %230 : vector<8x128xf32>
    %232 = vector.extract_strided_slice %231 {offsets = [0, 0], sizes = [8, 32], strides = [1, 1]} : vector<8x128xf32> to vector<8x32xf32>
    %233 = vector.extract_strided_slice %231 {offsets = [0, 32], sizes = [8, 32], strides = [1, 1]} : vector<8x128xf32> to vector<8x32xf32>
    %234 = vector.extract_strided_slice %227 {offsets = [0, 64], sizes = [8, 32], strides = [1, 1]} : vector<8x128xf32> to vector<8x32xf32>
    %235 = vector.extract_strided_slice %231 {offsets = [0, 96], sizes = [8, 32], strides = [1, 1]} : vector<8x128xf32> to vector<8x32xf32>
    %236 = arith.mulf %233, %193 : vector<8x32xf32>
    %237 = arith.mulf %232, %234 : vector<8x32xf32>
    %238 = arith.addf %236, %237 : vector<8x32xf32>
    %239 = math.tanh %238 : vector<8x32xf32>
    %240 = arith.mulf %235, %239 : vector<8x32xf32>
    %241 = arith.truncf %195 : vector<8x32xf32> to vector<8x32xbf16>
    %cst_65 = arith.constant dense<0.000000e+00> : vector<8x128xf32>
    %242 = tpu.matmul %241, %11, %cst_65 {dimension_numbers = #tpu.dot_dimension_numbers<[1], [0], [0], [1], [0, 0, 1, 1], [], []>} : vector<8x32xbf16>, vector<32x128xbf16>, vector<8x128xf32> -> vector<8x128xf32>
    %243 = arith.truncf %216 : vector<8x32xf32> to vector<8x32xbf16>
    %cst_66 = arith.constant dense<0.000000e+00> : vector<8x128xf32>
    %244 = tpu.matmul %243, %13, %cst_66 {dimension_numbers = #tpu.dot_dimension_numbers<[1], [0], [0], [1], [0, 0, 1, 1], [], []>} : vector<8x32xbf16>, vector<32x128xbf16>, vector<8x128xf32> -> vector<8x128xf32>
    %245 = arith.addf %242, %244 : vector<8x128xf32>
    %246 = vector.broadcast %15 : vector<1x128xf32> to vector<8x128xf32>
    %247 = arith.addf %245, %246 : vector<8x128xf32>
    %248 = math.tanh %247 : vector<8x128xf32>
    %cst_67 = arith.constant 5.000000e-01 : f32
    %249 = vector.broadcast %cst_67 : f32 to vector<8x128xf32>
    %250 = arith.mulf %249, %248 : vector<8x128xf32>
    %cst_68 = arith.constant 5.000000e-01 : f32
    %251 = vector.broadcast %cst_68 : f32 to vector<8x128xf32>
    %252 = arith.addf %250, %251 : vector<8x128xf32>
    %253 = vector.extract_strided_slice %252 {offsets = [0, 0], sizes = [8, 32], strides = [1, 1]} : vector<8x128xf32> to vector<8x32xf32>
    %254 = vector.extract_strided_slice %252 {offsets = [0, 32], sizes = [8, 32], strides = [1, 1]} : vector<8x128xf32> to vector<8x32xf32>
    %255 = vector.extract_strided_slice %248 {offsets = [0, 64], sizes = [8, 32], strides = [1, 1]} : vector<8x128xf32> to vector<8x32xf32>
    %256 = vector.extract_strided_slice %252 {offsets = [0, 96], sizes = [8, 32], strides = [1, 1]} : vector<8x128xf32> to vector<8x32xf32>
    %257 = arith.mulf %254, %214 : vector<8x32xf32>
    %258 = arith.mulf %253, %255 : vector<8x32xf32>
    %259 = arith.addf %257, %258 : vector<8x32xf32>
    %260 = math.tanh %259 : vector<8x32xf32>
    %261 = arith.mulf %256, %260 : vector<8x32xf32>
    %c4_i32 = arith.constant 4 : i32
    %262 = arith.addi %3, %c4_i32 : i32
    %263 = vector.broadcast %262 : i32 to vector<8x1xi32>
    %264 = arith.cmpi eq, %6, %263 : vector<8x1xi32>
    %265 = vector.shape_cast %264 : vector<8x1xi1> to vector<8x1xi1>
    %266 = vector.broadcast %265 : vector<8x1xi1> to vector<8x32xi1>
    %267 = arith.select %266, %261, %222 : vector<8x32xi1>, vector<8x32xf32>
    %268 = vector.extract_strided_slice %8 {offsets = [48, 0], sizes = [8, 128], strides = [1, 1]} : vector<64x128xf32> to vector<8x128xf32>
    %269 = arith.truncf %240 : vector<8x32xf32> to vector<8x32xbf16>
    %cst_69 = arith.constant dense<0.000000e+00> : vector<8x128xf32>
    %270 = tpu.matmul %269, %9, %cst_69 {dimension_numbers = #tpu.dot_dimension_numbers<[1], [0], [0], [1], [0, 0, 1, 1], [], []>} : vector<8x32xbf16>, vector<32x128xbf16>, vector<8x128xf32> -> vector<8x128xf32>
    %271 = arith.addf %268, %270 : vector<8x128xf32>
    %272 = math.tanh %271 : vector<8x128xf32>
    %cst_70 = arith.constant 5.000000e-01 : f32
    %273 = vector.broadcast %cst_70 : f32 to vector<8x128xf32>
    %274 = arith.mulf %273, %272 : vector<8x128xf32>
    %cst_71 = arith.constant 5.000000e-01 : f32
    %275 = vector.broadcast %cst_71 : f32 to vector<8x128xf32>
    %276 = arith.addf %274, %275 : vector<8x128xf32>
    %277 = vector.extract_strided_slice %276 {offsets = [0, 0], sizes = [8, 32], strides = [1, 1]} : vector<8x128xf32> to vector<8x32xf32>
    %278 = vector.extract_strided_slice %276 {offsets = [0, 32], sizes = [8, 32], strides = [1, 1]} : vector<8x128xf32> to vector<8x32xf32>
    %279 = vector.extract_strided_slice %272 {offsets = [0, 64], sizes = [8, 32], strides = [1, 1]} : vector<8x128xf32> to vector<8x32xf32>
    %280 = vector.extract_strided_slice %276 {offsets = [0, 96], sizes = [8, 32], strides = [1, 1]} : vector<8x128xf32> to vector<8x32xf32>
    %281 = arith.mulf %278, %238 : vector<8x32xf32>
    %282 = arith.mulf %277, %279 : vector<8x32xf32>
    %283 = arith.addf %281, %282 : vector<8x32xf32>
    %284 = math.tanh %283 : vector<8x32xf32>
    %285 = arith.mulf %280, %284 : vector<8x32xf32>
    %286 = arith.truncf %240 : vector<8x32xf32> to vector<8x32xbf16>
    %cst_72 = arith.constant dense<0.000000e+00> : vector<8x128xf32>
    %287 = tpu.matmul %286, %11, %cst_72 {dimension_numbers = #tpu.dot_dimension_numbers<[1], [0], [0], [1], [0, 0, 1, 1], [], []>} : vector<8x32xbf16>, vector<32x128xbf16>, vector<8x128xf32> -> vector<8x128xf32>
    %288 = arith.truncf %261 : vector<8x32xf32> to vector<8x32xbf16>
    %cst_73 = arith.constant dense<0.000000e+00> : vector<8x128xf32>
    %289 = tpu.matmul %288, %13, %cst_73 {dimension_numbers = #tpu.dot_dimension_numbers<[1], [0], [0], [1], [0, 0, 1, 1], [], []>} : vector<8x32xbf16>, vector<32x128xbf16>, vector<8x128xf32> -> vector<8x128xf32>
    %290 = arith.addf %287, %289 : vector<8x128xf32>
    %291 = vector.broadcast %15 : vector<1x128xf32> to vector<8x128xf32>
    %292 = arith.addf %290, %291 : vector<8x128xf32>
    %293 = math.tanh %292 : vector<8x128xf32>
    %cst_74 = arith.constant 5.000000e-01 : f32
    %294 = vector.broadcast %cst_74 : f32 to vector<8x128xf32>
    %295 = arith.mulf %294, %293 : vector<8x128xf32>
    %cst_75 = arith.constant 5.000000e-01 : f32
    %296 = vector.broadcast %cst_75 : f32 to vector<8x128xf32>
    %297 = arith.addf %295, %296 : vector<8x128xf32>
    %298 = vector.extract_strided_slice %297 {offsets = [0, 0], sizes = [8, 32], strides = [1, 1]} : vector<8x128xf32> to vector<8x32xf32>
    %299 = vector.extract_strided_slice %297 {offsets = [0, 32], sizes = [8, 32], strides = [1, 1]} : vector<8x128xf32> to vector<8x32xf32>
    %300 = vector.extract_strided_slice %293 {offsets = [0, 64], sizes = [8, 32], strides = [1, 1]} : vector<8x128xf32> to vector<8x32xf32>
    %301 = vector.extract_strided_slice %297 {offsets = [0, 96], sizes = [8, 32], strides = [1, 1]} : vector<8x128xf32> to vector<8x32xf32>
    %302 = arith.mulf %299, %259 : vector<8x32xf32>
    %303 = arith.mulf %298, %300 : vector<8x32xf32>
    %304 = arith.addf %302, %303 : vector<8x32xf32>
    %305 = math.tanh %304 : vector<8x32xf32>
    %306 = arith.mulf %301, %305 : vector<8x32xf32>
    %c5_i32 = arith.constant 5 : i32
    %307 = arith.addi %3, %c5_i32 : i32
    %308 = vector.broadcast %307 : i32 to vector<8x1xi32>
    %309 = arith.cmpi eq, %6, %308 : vector<8x1xi32>
    %310 = vector.shape_cast %309 : vector<8x1xi1> to vector<8x1xi1>
    %311 = vector.broadcast %310 : vector<8x1xi1> to vector<8x32xi1>
    %312 = arith.select %311, %306, %267 : vector<8x32xi1>, vector<8x32xf32>
    %313 = vector.extract_strided_slice %8 {offsets = [56, 0], sizes = [8, 128], strides = [1, 1]} : vector<64x128xf32> to vector<8x128xf32>
    %314 = arith.truncf %285 : vector<8x32xf32> to vector<8x32xbf16>
    %cst_76 = arith.constant dense<0.000000e+00> : vector<8x128xf32>
    %315 = tpu.matmul %314, %9, %cst_76 {dimension_numbers = #tpu.dot_dimension_numbers<[1], [0], [0], [1], [0, 0, 1, 1], [], []>} : vector<8x32xbf16>, vector<32x128xbf16>, vector<8x128xf32> -> vector<8x128xf32>
    %316 = arith.addf %313, %315 : vector<8x128xf32>
    %317 = math.tanh %316 : vector<8x128xf32>
    %cst_77 = arith.constant 5.000000e-01 : f32
    %318 = vector.broadcast %cst_77 : f32 to vector<8x128xf32>
    %319 = arith.mulf %318, %317 : vector<8x128xf32>
    %cst_78 = arith.constant 5.000000e-01 : f32
    %320 = vector.broadcast %cst_78 : f32 to vector<8x128xf32>
    %321 = arith.addf %319, %320 : vector<8x128xf32>
    %322 = vector.extract_strided_slice %321 {offsets = [0, 0], sizes = [8, 32], strides = [1, 1]} : vector<8x128xf32> to vector<8x32xf32>
    %323 = vector.extract_strided_slice %321 {offsets = [0, 32], sizes = [8, 32], strides = [1, 1]} : vector<8x128xf32> to vector<8x32xf32>
    %324 = vector.extract_strided_slice %317 {offsets = [0, 64], sizes = [8, 32], strides = [1, 1]} : vector<8x128xf32> to vector<8x32xf32>
    %325 = vector.extract_strided_slice %321 {offsets = [0, 96], sizes = [8, 32], strides = [1, 1]} : vector<8x128xf32> to vector<8x32xf32>
    %326 = arith.mulf %323, %283 : vector<8x32xf32>
    %327 = arith.mulf %322, %324 : vector<8x32xf32>
    %328 = arith.addf %326, %327 : vector<8x32xf32>
    %329 = math.tanh %328 : vector<8x32xf32>
    %330 = arith.mulf %325, %329 : vector<8x32xf32>
    %331 = arith.truncf %285 : vector<8x32xf32> to vector<8x32xbf16>
    %cst_79 = arith.constant dense<0.000000e+00> : vector<8x128xf32>
    %332 = tpu.matmul %331, %11, %cst_79 {dimension_numbers = #tpu.dot_dimension_numbers<[1], [0], [0], [1], [0, 0, 1, 1], [], []>} : vector<8x32xbf16>, vector<32x128xbf16>, vector<8x128xf32> -> vector<8x128xf32>
    %333 = arith.truncf %306 : vector<8x32xf32> to vector<8x32xbf16>
    %cst_80 = arith.constant dense<0.000000e+00> : vector<8x128xf32>
    %334 = tpu.matmul %333, %13, %cst_80 {dimension_numbers = #tpu.dot_dimension_numbers<[1], [0], [0], [1], [0, 0, 1, 1], [], []>} : vector<8x32xbf16>, vector<32x128xbf16>, vector<8x128xf32> -> vector<8x128xf32>
    %335 = arith.addf %332, %334 : vector<8x128xf32>
    %336 = vector.broadcast %15 : vector<1x128xf32> to vector<8x128xf32>
    %337 = arith.addf %335, %336 : vector<8x128xf32>
    %338 = math.tanh %337 : vector<8x128xf32>
    %cst_81 = arith.constant 5.000000e-01 : f32
    %339 = vector.broadcast %cst_81 : f32 to vector<8x128xf32>
    %340 = arith.mulf %339, %338 : vector<8x128xf32>
    %cst_82 = arith.constant 5.000000e-01 : f32
    %341 = vector.broadcast %cst_82 : f32 to vector<8x128xf32>
    %342 = arith.addf %340, %341 : vector<8x128xf32>
    %343 = vector.extract_strided_slice %342 {offsets = [0, 0], sizes = [8, 32], strides = [1, 1]} : vector<8x128xf32> to vector<8x32xf32>
    %344 = vector.extract_strided_slice %342 {offsets = [0, 32], sizes = [8, 32], strides = [1, 1]} : vector<8x128xf32> to vector<8x32xf32>
    %345 = vector.extract_strided_slice %338 {offsets = [0, 64], sizes = [8, 32], strides = [1, 1]} : vector<8x128xf32> to vector<8x32xf32>
    %346 = vector.extract_strided_slice %342 {offsets = [0, 96], sizes = [8, 32], strides = [1, 1]} : vector<8x128xf32> to vector<8x32xf32>
    %347 = arith.mulf %344, %304 : vector<8x32xf32>
    %348 = arith.mulf %343, %345 : vector<8x32xf32>
    %349 = arith.addf %347, %348 : vector<8x32xf32>
    %350 = math.tanh %349 : vector<8x32xf32>
    %351 = arith.mulf %346, %350 : vector<8x32xf32>
    %c6_i32 = arith.constant 6 : i32
    %352 = arith.addi %3, %c6_i32 : i32
    %353 = vector.broadcast %352 : i32 to vector<8x1xi32>
    %354 = arith.cmpi eq, %6, %353 : vector<8x1xi32>
    %355 = vector.shape_cast %354 : vector<8x1xi1> to vector<8x1xi1>
    %356 = vector.broadcast %355 : vector<8x1xi1> to vector<8x32xi1>
    %357 = arith.select %356, %351, %312 : vector<8x32xi1>, vector<8x32xf32>
    %358 = arith.truncf %330 : vector<8x32xf32> to vector<8x32xbf16>
    %cst_83 = arith.constant dense<0.000000e+00> : vector<8x128xf32>
    %359 = tpu.matmul %358, %11, %cst_83 {dimension_numbers = #tpu.dot_dimension_numbers<[1], [0], [0], [1], [0, 0, 1, 1], [], []>} : vector<8x32xbf16>, vector<32x128xbf16>, vector<8x128xf32> -> vector<8x128xf32>
    %360 = arith.truncf %351 : vector<8x32xf32> to vector<8x32xbf16>
    %cst_84 = arith.constant dense<0.000000e+00> : vector<8x128xf32>
    %361 = tpu.matmul %360, %13, %cst_84 {dimension_numbers = #tpu.dot_dimension_numbers<[1], [0], [0], [1], [0, 0, 1, 1], [], []>} : vector<8x32xbf16>, vector<32x128xbf16>, vector<8x128xf32> -> vector<8x128xf32>
    %362 = arith.addf %359, %361 : vector<8x128xf32>
    %363 = vector.broadcast %15 : vector<1x128xf32> to vector<8x128xf32>
    %364 = arith.addf %362, %363 : vector<8x128xf32>
    %365 = math.tanh %364 : vector<8x128xf32>
    %cst_85 = arith.constant 5.000000e-01 : f32
    %366 = vector.broadcast %cst_85 : f32 to vector<8x128xf32>
    %367 = arith.mulf %366, %365 : vector<8x128xf32>
    %cst_86 = arith.constant 5.000000e-01 : f32
    %368 = vector.broadcast %cst_86 : f32 to vector<8x128xf32>
    %369 = arith.addf %367, %368 : vector<8x128xf32>
    %370 = vector.extract_strided_slice %369 {offsets = [0, 0], sizes = [8, 32], strides = [1, 1]} : vector<8x128xf32> to vector<8x32xf32>
    %371 = vector.extract_strided_slice %369 {offsets = [0, 32], sizes = [8, 32], strides = [1, 1]} : vector<8x128xf32> to vector<8x32xf32>
    %372 = vector.extract_strided_slice %365 {offsets = [0, 64], sizes = [8, 32], strides = [1, 1]} : vector<8x128xf32> to vector<8x32xf32>
    %373 = vector.extract_strided_slice %369 {offsets = [0, 96], sizes = [8, 32], strides = [1, 1]} : vector<8x128xf32> to vector<8x32xf32>
    %374 = arith.mulf %371, %349 : vector<8x32xf32>
    %375 = arith.mulf %370, %372 : vector<8x32xf32>
    %376 = arith.addf %374, %375 : vector<8x32xf32>
    %377 = math.tanh %376 : vector<8x32xf32>
    %378 = arith.mulf %373, %377 : vector<8x32xf32>
    %c7_i32 = arith.constant 7 : i32
    %379 = arith.addi %3, %c7_i32 : i32
    %380 = vector.broadcast %379 : i32 to vector<8x1xi32>
    %381 = arith.cmpi eq, %6, %380 : vector<8x1xi32>
    %382 = vector.shape_cast %381 : vector<8x1xi1> to vector<8x1xi1>
    %383 = vector.broadcast %382 : vector<8x1xi1> to vector<8x32xi1>
    %384 = arith.select %383, %378, %357 : vector<8x32xi1>, vector<8x32xf32>
    %c0_87 = arith.constant 0 : index
    %c0_88 = arith.constant 0 : index
    %c0_89 = arith.constant 0 : index
    %385 = vector.load %arg11[%c0_87, %c0_88, %c0_89] : memref<2x8x32xf32, #tpu.memory_space<vmem>>, vector<1x8x32xf32>
    %386 = vector.shape_cast %385 : vector<1x8x32xf32> to vector<8x32xf32>
    %387 = vector.shape_cast %330 : vector<8x32xf32> to vector<1x8x32xf32>
    tpu.vector_store %arg11[%c0_87, %c0_88, %c0_89], %387 {strides = array<i32>} : memref<2x8x32xf32, #tpu.memory_space<vmem>>, vector<1x8x32xf32>,
    %c0_90 = arith.constant 0 : index
    %c0_91 = arith.constant 0 : index
    %c0_92 = arith.constant 0 : index
    %388 = vector.load %arg12[%c0_90, %c0_91, %c0_92] : memref<2x8x32xf32, #tpu.memory_space<vmem>>, vector<1x8x32xf32>
    %389 = vector.shape_cast %388 : vector<1x8x32xf32> to vector<8x32xf32>
    %390 = vector.shape_cast %328 : vector<8x32xf32> to vector<1x8x32xf32>
    tpu.vector_store %arg12[%c0_90, %c0_91, %c0_92], %390 {strides = array<i32>} : memref<2x8x32xf32, #tpu.memory_space<vmem>>, vector<1x8x32xf32>,
    %c1_93 = arith.constant 1 : index
    %c0_94 = arith.constant 0 : index
    %c0_95 = arith.constant 0 : index
    %391 = vector.load %arg11[%c1_93, %c0_94, %c0_95] : memref<2x8x32xf32, #tpu.memory_space<vmem>>, vector<1x8x32xf32>
    %392 = vector.shape_cast %391 : vector<1x8x32xf32> to vector<8x32xf32>
    %393 = vector.shape_cast %378 : vector<8x32xf32> to vector<1x8x32xf32>
    tpu.vector_store %arg11[%c1_93, %c0_94, %c0_95], %393 {strides = array<i32>} : memref<2x8x32xf32, #tpu.memory_space<vmem>>, vector<1x8x32xf32>,
    %c1_96 = arith.constant 1 : index
    %c0_97 = arith.constant 0 : index
    %c0_98 = arith.constant 0 : index
    %394 = vector.load %arg12[%c1_96, %c0_97, %c0_98] : memref<2x8x32xf32, #tpu.memory_space<vmem>>, vector<1x8x32xf32>
    %395 = vector.shape_cast %394 : vector<1x8x32xf32> to vector<8x32xf32>
    %396 = vector.shape_cast %376 : vector<8x32xf32> to vector<1x8x32xf32>
    tpu.vector_store %arg12[%c1_96, %c0_97, %c0_98], %396 {strides = array<i32>} : memref<2x8x32xf32, #tpu.memory_space<vmem>>, vector<1x8x32xf32>,
    %c0_99 = arith.constant 0 : index
    %c0_100 = arith.constant 0 : index
    %397 = vector.load %arg13[%c0_99, %c0_100] : memref<8x32xf32, #tpu.memory_space<vmem>>, vector<8x32xf32>
    tpu.vector_store %arg13[%c0_99, %c0_100], %384 {strides = array<i32>} : memref<8x32xf32, #tpu.memory_space<vmem>>, vector<8x32xf32>,
    %c0_i32_101 = arith.constant 0 : i32
    %398 = arith.cmpi eq, %arg1, %c0_i32_101 : i32
    %399 = arith.extui %398 : i1 to i32
    %c0_i32_102 = arith.constant 0 : i32
    %400 = arith.cmpi ne, %399, %c0_i32_102 : i32
    scf.if %400 {
      %c0_103 = arith.constant 0 : index
      %c0_104 = arith.constant 0 : index
      %401 = vector.load %arg13[%c0_103, %c0_104] : memref<8x32xf32, #tpu.memory_space<vmem>>, vector<8x32xf32>
      %402 = arith.truncf %401 : vector<8x32xf32> to vector<8x32xbf16>
      %c0_105 = arith.constant 0 : index
      %c0_106 = arith.constant 0 : index
      %403 = vector.load %arg8[%c0_105, %c0_106] : memref<32x128xbf16, #tpu.memory_space<vmem>>, vector<32x128xbf16>
      %cst_107 = arith.constant dense<0.000000e+00> : vector<8x128xf32>
      %404 = tpu.matmul %402, %403, %cst_107 {dimension_numbers = #tpu.dot_dimension_numbers<[1], [0], [0], [1], [0, 0, 1, 1], [], []>} : vector<8x32xbf16>, vector<32x128xbf16>, vector<8x128xf32> -> vector<8x128xf32>
      %c0_108 = arith.constant 0 : index
      %c0_109 = arith.constant 0 : index
      %405 = vector.load %arg9[%c0_108, %c0_109] : memref<1x128xf32, #tpu.memory_space<vmem>>, vector<1x128xf32>
      %406 = vector.broadcast %405 : vector<1x128xf32> to vector<8x128xf32>
      %407 = arith.addf %404, %406 : vector<8x128xf32>
      %c0_110 = arith.constant 0 : index
      %c0_111 = arith.constant 0 : index
      %408 = vector.load %arg10[%c0_110, %c0_111] : memref<8x128xf32, #tpu.memory_space<vmem>>, vector<8x128xf32>
      tpu.vector_store %arg10[%c0_110, %c0_111], %407 {strides = array<i32>} : memref<8x128xf32, #tpu.memory_space<vmem>>, vector<8x128xf32>,
    } else {
    }
    return
  }
  func.func @transform_0(%arg0: i32, %arg1: i32) -> (i32, i32) {
    %c0_i32 = arith.constant 0 : i32
    %c0_i32_0 = arith.constant 0 : i32
    return %arg0, %c0_i32 : i32, i32
  }
  func.func @transform_1(%arg0: i32, %arg1: i32) -> (i32, i32, i32, i32) {
    %c0_i32 = arith.constant 0 : i32
    %c0_i32_0 = arith.constant 0 : i32
    %c0_i32_1 = arith.constant 0 : i32
    return %arg1, %arg0, %c0_i32, %c0_i32_0 : i32, i32, i32, i32
  }
  func.func @transform_2(%arg0: i32, %arg1: i32) -> (i32, i32) {
    %c0_i32 = arith.constant 0 : i32
    %c0_i32_0 = arith.constant 0 : i32
    %c0_i32_1 = arith.constant 0 : i32
    return %c0_i32, %c0_i32_0 : i32, i32
  }
  func.func @transform_3(%arg0: i32, %arg1: i32) -> (i32, i32, i32) {
    %c0_i32 = arith.constant 0 : i32
    %c0_i32_0 = arith.constant 0 : i32
    %c0_i32_1 = arith.constant 0 : i32
    %c0_i32_2 = arith.constant 0 : i32
    return %c0_i32, %c0_i32_0, %c0_i32_1 : i32, i32, i32
  }
  func.func @transform_4(%arg0: i32, %arg1: i32) -> (i32, i32, i32) {
    %c0_i32 = arith.constant 0 : i32
    %c0_i32_0 = arith.constant 0 : i32
    %c0_i32_1 = arith.constant 0 : i32
    %c0_i32_2 = arith.constant 0 : i32
    return %c0_i32, %c0_i32_0, %c0_i32_1 : i32, i32, i32
  }
  func.func @transform_5(%arg0: i32, %arg1: i32) -> (i32, i32, i32) {
    %c0_i32 = arith.constant 0 : i32
    %c0_i32_0 = arith.constant 0 : i32
    %c0_i32_1 = arith.constant 0 : i32
    %c0_i32_2 = arith.constant 0 : i32
    return %c0_i32, %c0_i32_0, %c0_i32_1 : i32, i32, i32
  }
  func.func @transform_6(%arg0: i32, %arg1: i32) -> (i32, i32) {
    %c0_i32 = arith.constant 0 : i32
    %c0_i32_0 = arith.constant 0 : i32
    %c0_i32_1 = arith.constant 0 : i32
    return %c0_i32, %c0_i32_0 : i32, i32
  }
  func.func @transform_7(%arg0: i32, %arg1: i32) -> (i32, i32) {
    %c0_i32 = arith.constant 0 : i32
    %c0_i32_0 = arith.constant 0 : i32
    %c0_i32_1 = arith.constant 0 : i32
    return %c0_i32, %c0_i32_0 : i32, i32
  }
  func.func @transform_8(%arg0: i32, %arg1: i32) -> (i32, i32) {
    %c0_i32 = arith.constant 0 : i32
    %c0_i32_0 = arith.constant 0 : i32
    return %arg0, %c0_i32 : i32, i32
  }
}

</mosaic_0001>

<bundles_post_ra>
// kernel: tpu_custom_call.1
= control target key start
LH: loop header
LB: loop body
LE: loop exit
PB: predicated region body
PF: predicated region fallthrough
CT: control target
= control target key end

     0   :  { %13 = vsyncpa [#allocation6], 0  ;;  %s1743_s0 = inlined_call_operand.vmem [shape: s32[8,1], index: 0, kind: input, shape index: {}]   ;;  %s1744_s1 = inlined_call_operand.hbm [shape: f32[1,1,64,128], index: 1, kind: input, shape index: {}]   ;;  %s1745_s2 = inlined_call_operand.hbm [shape: bf16[32,128], index: 2, kind: input, shape index: {}]   ;;  %s1746_s3 = inlined_call_operand.hbm [shape: bf16[1,32,128], index: 3, kind: input, shape index: {}]   ;;  %s1747_s4 = inlined_call_operand.hbm [shape: bf16[1,32,128], index: 4, kind: input, shape index: {}]   ;;  %s1748_s5 = inlined_call_operand.vmem [shape: f32[1,1,128], index: 5, kind: input, shape index: {}]   ;;  %s1749_s6 = inlined_call_operand.hbm [shape: bf16[32,128], index: 6, kind: input, shape index: {}]   ;;  %s1750_s7 = inlined_call_operand.vmem [shape: f32[1,128], index: 7, kind: input, shape index: {}]   ;;  %s1751_s8 = inlined_call_operand.hbm [shape: f32[8,128], index: 8, kind: output, shape index: {}]  }
   0x1   :  { %14 = vsyncpa [#allocation9], 0 }
   0x2   :  { %15 = vsyncpa [#allocation12], 0  ;;  %s36_s29 = sshll.u32 %s1745_s2, 4  ;;  %s37_s29 = int_to_ptr.hbm [resolvable:$true] %s36_s29 }
   0x3   :  { %16 = vsyncpa [#allocation7], 0  ;;  %s1421_s30 = smov [#allocation8]   ;;  %s62_s12 = sshll.u32 %s1747_s4, 4  ;;  %s63_s12 = int_to_ptr.hbm [resolvable:$true] %s62_s12 }
   0x4   :  { %s38_s9 = sshll.u32 %s1421_s30, 4  ;;  %s1422_s13 = smov 64   ;;  %s39_s9 = int_to_ptr.vmem [resolvable:$true] %s38_s9 }
   0x5   :  { %s1423_s14 = smov 4   ;;  %s1424_s15 = smov [#allocation11]  }
   0x6   :  { %44 = dma.hbm_to_vmem [thread:$0]  %s37_s29, 256, %s39_s9, [#allocation9], %s1422_s13, %s1422_s13, %s1423_s14  }
   0x7   :  { %s64_s16 = sshll.u32 %s1424_s15, 4  ;;  %s23_s18 = sshll.u32 %s1744_s1, 4  ;;  %s65_s16 = int_to_ptr.vmem [resolvable:$true] %s64_s16  ;;  %s24_s18 = int_to_ptr.hbm [resolvable:$true] %s23_s18 }
   0x8   :  { %70 = dma.hbm_to_vmem [thread:$0]  %s63_s12, 256, %s65_s16, [#allocation12], %s1422_s13, %s1422_s13, %s1423_s14  }
   0x9   :  { %s1425_s4 = smov [#allocation5]   ;;  %s49_s22 = sshll.u32 %s1746_s3, 4  ;;  %s50_s22 = int_to_ptr.hbm [resolvable:$true] %s49_s22 }
   0xa   :  { %s25_s19 = sshll.u32 %s1425_s4, 4  ;;  %s1426_s23 = smov 128   ;;  %s26_s19 = int_to_ptr.vmem [resolvable:$true] %s25_s19 }
   0xb   :  { %s1427_s24 = smov 8   ;;  %s1428_s25 = smov [#allocation10]  }
   0xc   :  { %31 = dma.hbm_to_vmem [thread:$0]  %s24_s18, 1024, %s26_s19, [#allocation6], %s1426_s23, %s1426_s23, %s1427_s24  }
   0xd   :  { %s51_s26 = sshll.u32 %s1428_s25, 4  ;;  %s77_s28 = sshll.u32 %s1749_s6, 4  ;;  %s52_s26 = int_to_ptr.vmem [resolvable:$true] %s51_s26  ;;  %s78_s28 = int_to_ptr.hbm [resolvable:$true] %s77_s28 }
   0xe   :  { %57 = dma.hbm_to_vmem [thread:$0]  %s50_s22, 256, %s52_s26, [#allocation9], %s1422_s13, %s1422_s13, %s1423_s14  }
   0xf   :  { %s1429_s29 = smov [#allocation13]  }
  0x10   :  { %s79_s30 = sshll.u32 %s1429_s29, 4  ;;  %s80_s30 = int_to_ptr.vmem [resolvable:$true] %s79_s30 }
  0x11   :  { %85 = dma.hbm_to_vmem [thread:$0]  %s78_s28, 256, %s80_s30, [#allocation12], %s1422_s13, %s1422_s13, %s1423_s14  }
  0x12   :  { %1413 = dma.done.wait [#allocation6], 1024  }
  0x13   :  { %1414 = vsyncadd [#allocation6], 4294966272 }
  0x14   :  { %1415 = dma.done.wait [#allocation9], 512  }
  0x15   :  { %1416 = vsyncadd [#allocation9], 4294966784 }
  0x16   :  { %1417 = dma.done.wait [#allocation12], 512  }
  0x17   :  { %1418 = vsyncadd [#allocation12], 4294966784  ;;  %vm113_vm0 = vcmask 261120   ;;  %v1430_v0 = vmov 0.0   ;;  %v1512_v1 = vld [vmem:[#allocation8 + $0x8] sm:$0xff]  ;;  %v1515_v2 = vld [vmem:[#allocation8] sm:$0xff] }
  0x18   :  { %114 = vst.msk [vmem:[#allocation2] sm:$0xff] %vm113_vm0, %v1430_v0  ;;  %173 = vmatpush.bf16.msra.mxu0 %v1512_v1  ;;  %218 = vmatpush.bf16.msra.mxu1 %v1512_v1  ;;  %v122_v5 = vld [vmem:[#allocation5] sm:$0xff]  ;;  %s1431_s3 = smov 32   ;;  %v1530_v20 = vld [vmem:[#allocation11 + $0x8] sm:$0xff]  ;;  %v1532_v21 = vld [vmem:[#allocation10 + $0x8] sm:$0xff]  ;;  %s1108_s17 = sshll.u32 %s1751_s8, 4  ;;  %s1109_s17 = int_to_ptr.hbm [resolvable:$true] %s1108_s17 }
  0x19   :  { %115 = vst.msk [vmem:[#allocation2 + $0x8] sm:$0xff] %vm113_vm0, %v1430_v0  ;;  %268 = vmatpush.bf16.msra.mxu2 %v1530_v20  ;;  %v1535_v22 = vld [vmem:[#allocation11] sm:$0xff]  ;;  %293 = vmatpush.bf16.msra.mxu3 %v1532_v21  ;;  %v1539_v24 = vld [vmem:[#allocation10] sm:$0xff]  ;;  %v123_v32 = vld [vmem:[#allocation5 + $0x8] sm:$0xff] }
  0x1a   :  { %116 = vst.msk [vmem:[#allocation3] sm:$0xff] %vm113_vm0, %v1430_v0  ;;  %v1563_v35 = vld [vmem:[%s1748_s5] ss:$0 sm:$0xff] }
  0x1b   :  { %117 = vst.msk [vmem:[#allocation3 + $0x8] sm:$0xff] %vm113_vm0, %v1430_v0 }
  0x1c   :  { %118 = vst.msk [vmem:[#allocation4] sm:$0xff] %vm113_vm0, %v1430_v0  ;;  %174 = vmatpush.bf16.msra.mxu0 %v1515_v2  ;;  %219 = vmatpush.bf16.msra.mxu1 %v1515_v2 }
  0x1d   :  { %269 = vmatpush.bf16.msra.mxu2 %v1535_v22  ;;  %294 = vmatpush.bf16.msra.mxu3 %v1539_v24 }
  0x1f   :  { %v143_v3 = vld [vmem:[#allocation2] sm:$0xff] }
  0x20   :  { %v150_v4 = vpack.c.bf16 %v143_v3, %v143_v3  ;;  %353 = vmatpush.bf16.msrb.mxu0 %v1512_v1  ;;  %v145_v23 = vld [vmem:[#allocation2 + $0x8] sm:$0xff]  ;;  %394 = vmatpush.bf16.msrb.mxu1 %v1530_v20 }
  0x21   :  { %v146_v10 = vld [vmem:[#allocation3] sm:$0xff]  ;;  %v246_v25 = vpack.c.bf16 %v145_v23, %v145_v23  ;;  %407 = vmatpush.bf16.msrb.mxu2 %v1532_v21  ;;  %457 = vmatpush.bf16.msrb.mxu3 %v1512_v1 }
  0x22   :  { %1129 = vmatmul.msk.bf16.vlgmr.msra.gmra.mxu0 %vm113_vm0, %v150_v4  ;;  %v148_v42 = vld [vmem:[#allocation3 + $0x8] sm:$0xff] }
  0x23   :  { %1139 = vmatmul.msk.bf16.vlgmr.msra.gmra.mxu2 %vm113_vm0, %v246_v25 }
  0x24   :  { %354 = vmatpush.bf16.msrb.mxu0 %v1515_v2  ;;  %395 = vmatpush.bf16.msrb.mxu1 %v1535_v22 }
  0x25   :  { %408 = vmatpush.bf16.msrb.mxu2 %v1539_v24  ;;  %458 = vmatpush.bf16.msrb.mxu3 %v1515_v2 }
  0x28   :  { %498 = vmatpush.bf16.msra.mxu0 %v1530_v20 }
  0x29   :  { %561 = vmatpush.bf16.msra.mxu2 %v1512_v1 }
  0x2c   :  { %499 = vmatpush.bf16.msra.mxu0 %v1535_v22 }
  0x2d   :  { %562 = vmatpush.bf16.msra.mxu2 %v1515_v2 }
  0x9f   :  { %v176_v6 = vpop.f32.mrf.mxu0 }
  0xa0   :  { %v180_v7 = vadd.f32 %v176_v6, %v122_v5 }
  0xa2   :  { %1205 = vtanh.f32 %v180_v7  ;;  %v124_v7 = vld [vmem:[#allocation5 + $0x10] sm:$0xff] }
  0xa6   :  { %v271_v30 = vpop.f32.mrf.mxu2 }
  0xa7   :  { %v178_v8 = vpop.f32.mrf.mxu0 }
  0xa8   :  { %v1206_v9 = vpop.eup %1205 }
  0xa9   :  { %190 = vrot.lane.b32.xlu0 %v1206_v9, %s1422_s13  ;;  %v182_v11 = vmul.f32 0.5, %v1206_v9 }
  0xab   :  { %v183_v12 = vadd.f32 0.5, %v182_v11 }
  0xae   :  { %v273_v31 = vpop.f32.mrf.mxu2 }
  0xb1   :  { %185 = vrot.lane.b32.xlu0 %v146_v10, %s1431_s3 }
 0x11b   :  { %v191_v13 = vpop.permute.xlu0 %190 }
 0x11c   :  { %v193_v14 = vmul.f32 %v191_v13, %v183_v12 }
 0x11e   :  { %195 = vrot.lane.b32.xlu1 %v193_v14, %s1431_s3 }
 0x123   :  { %v186_v15 = vpop.permute.xlu0 %185 }
 0x124   :  { %v188_v16 = vmul.f32 %v186_v15, %v183_v12 }
 0x190   :  { %v196_v17 = vpop.permute.xlu1 %195 }
 0x191   :  { %v1526_v18 = vadd.f32 %v196_v17, %v188_v16 }
 0x193   :  { %1207 = vtanh.f32 %v1526_v18 }
 0x199   :  { %v1208_v19 = vpop.eup %1207 }
 0x19a   :  { %201 = vrot.lane.b32.xlu1 %v1208_v19, %s1422_s13 }
 0x20c   :  { %v202_v26 = vpop.permute.xlu1 %201 }
 0x20d   :  { %v204_v27 = vmul.f32 %v202_v26, %v183_v12 }
 0x20f   :  { %v205_v28 = vpack.c.bf16 %v204_v27, %v204_v27 }
 0x211   :  { %207 = vrot.lane.b32.xlu2 %v205_v28, %s1431_s3 }
 0x26b   :  { %v208_v29 = vpop.permute.xlu2 %207 }
 0x26c   :  { %1130 = vmatmul.msk.bf16.vlgmr.msra.gmra.mxu1 %vm113_vm0, %v208_v29  ;;  %1148 = vmatmul.msk.bf16.vlgmr.msra.gmra.mxu3 %vm113_vm0, %v208_v29 }
 0x26d   :  { %511 = vmatpush.bf16.msra.mxu1 %v1532_v21  ;;  %602 = vmatpush.bf16.msra.mxu3 %v1530_v20 }
 0x271   :  { %512 = vmatpush.bf16.msra.mxu1 %v1539_v24  ;;  %603 = vmatpush.bf16.msra.mxu3 %v1535_v22 }
 0x2e9   :  { %v221_v33 = vpop.f32.mrf.mxu1 }
 0x2ea   :  { %v225_v34 = vadd.f32 %v221_v33, %v123_v32 }
 0x2ec   :  { %1209 = vtanh.f32 %v225_v34 }
 0x2ef   :  { %v296_v36 = vpop.f32.mrf.mxu3 }
 0x2f0   :  { %v297_v37 = vadd.f32 %v296_v36, %v271_v30 }
 0x2f1   :  { %v223_v38 = vpop.f32.mrf.mxu1 }
 0x2f2   :  { %v1210_v39 = vpop.eup %1209  ;;  %v303_v40 = vadd.f32 %v1563_v35, %v297_v37 }
 0x2f3   :  { %231 = vrot.lane.b32.xlu2 %v1210_v39, %s1422_s13  ;;  %v227_v44 = vmul.f32 0.5, %v1210_v39 }
 0x2f4   :  { %1211 = vtanh.f32 %v303_v40 }
 0x2f5   :  { %v228_v45 = vadd.f32 0.5, %v227_v44 }
 0x2f7   :  { %v298_v41 = vpop.f32.mrf.mxu3  ;;  %v229_v52 = vmul.f32 %v228_v45, %v1526_v18 }
 0x2fa   :  { %v1212_v43 = vpop.eup %1211 }
 0x2fb   :  { %313 = vrot.lane.b32.xlu0 %v1212_v43, %s1422_s13  ;;  %308 = vrot.lane.b32.xlu2 %v148_v42, %s1431_s3  ;;  %v305_v48 = vmul.f32 0.5, %v1212_v43 }
 0x2fd   :  { %v306_v49 = vadd.f32 0.5, %v305_v48 }
 0x34d   :  { %v232_v46 = vpop.permute.xlu2 %231 }
 0x34e   :  { %v234_v47 = vmul.f32 %v232_v46, %v228_v45 }
 0x350   :  { %236 = vrot.lane.b32.xlu1 %v234_v47, %s1431_s3 }
 0x355   :  { %v309_v56 = vpop.permute.xlu2 %308 }
 0x356   :  { %v311_v57 = vmul.f32 %v309_v56, %v306_v49 }
 0x36d   :  { %v314_v50 = vpop.permute.xlu0 %313 }
 0x36e   :  { %v316_v51 = vmul.f32 %v314_v50, %v306_v49 }
 0x370   :  { %318 = vrot.lane.b32.xlu0 %v316_v51, %s1431_s3 }
 0x3c2   :  { %v237_v53 = vpop.permute.xlu1 %236 }
 0x3c3   :  { %v239_v54 = vadd.f32 %v237_v53, %v229_v52 }
 0x3c5   :  { %1213 = vtanh.f32 %v239_v54 }
 0x3cb   :  { %v1214_v55 = vpop.eup %1213 }
 0x3cc   :  { %242 = vrot.lane.b32.xlu1 %v1214_v55, %s1422_s13 }
 0x3e2   :  { %v319_v58 = vpop.permute.xlu0 %318 }
 0x3e3   :  { %v321_v59 = vadd.f32 %v319_v58, %v311_v57 }
 0x3e5   :  { %1215 = vtanh.f32 %v321_v59 }
 0x3eb   :  { %v1216_v60 = vpop.eup %1215 }
 0x3ec   :  { %324 = vrot.lane.b32.xlu2 %v1216_v60, %s1422_s13 }
 0x43e   :  { %v243_v61 = vpop.permute.xlu1 %242 }
 0x43f   :  { %v245_v62 = vmul.f32 %v243_v61, %v228_v45 }
 0x441   :  { %v340_v63 = vpack.c.bf16 %v245_v62, %v245_v62 }
 0x443   :  { %342 = vrot.lane.b32.xlu0 %v340_v63, %s1431_s3 }
 0x446   :  { %v325_v0 = vpop.permute.xlu2 %324 }
 0x447   :  { %v1575_v3 = vmul.f32 %v325_v0, %v306_v49  ;;  %v125_v49 = vld [vmem:[#allocation5 + $0x18] sm:$0xff] }
 0x449   :  { %v381_v4 = vpack.c.bf16 %v1575_v3, %v1575_v3 }
 0x44b   :  { %383 = vrot.lane.b32.xlu1 %v381_v4, %s1431_s3 }
 0x4b5   :  { %v343_v5 = vpop.permute.xlu0 %342 }
 0x4b6   :  { %1149 = vmatmul.msk.bf16.vlgmr.msrb.gmra.mxu0 %vm113_vm0, %v343_v5  ;;  %1151 = vmatmul.msk.bf16.vlgmr.msrb.gmra.mxu2 %vm113_vm0, %v343_v5 }
 0x4b7   :  { %615 = vmatpush.bf16.msrb.mxu0 %v1532_v21  ;;  %706 = vmatpush.bf16.msrb.mxu2 %v1530_v20 }
 0x4bb   :  { %616 = vmatpush.bf16.msrb.mxu0 %v1539_v24  ;;  %707 = vmatpush.bf16.msrb.mxu2 %v1535_v22 }
 0x4bd   :  { %v384_v6 = vpop.permute.xlu1 %383 }
 0x4be   :  { %1150 = vmatmul.msk.bf16.vlgmr.msrb.gmra.mxu1 %vm113_vm0, %v384_v6 }
 0x4bf   :  { %665 = vmatpush.bf16.msrb.mxu1 %v1512_v1 }
 0x4c3   :  { %666 = vmatpush.bf16.msrb.mxu1 %v1515_v2 }
 0x533   :  { %v356_v8 = vpop.f32.mrf.mxu0 }
 0x534   :  { %v360_v9 = vadd.f32 %v356_v8, %v124_v7 }
 0x536   :  { %1217 = vtanh.f32 %v360_v9 }
 0x539   :  { %v410_v10 = vpop.f32.mrf.mxu2 }
 0x53b   :  { %v358_v11 = vpop.f32.mrf.mxu0  ;;  %v397_v12 = vpop.f32.mrf.mxu1 }
 0x53c   :  { %v1218_v13 = vpop.eup %1217  ;;  %v411_v14 = vadd.f32 %v410_v10, %v397_v12 }
 0x53d   :  { %366 = vrot.lane.b32.xlu2 %v1218_v13, %s1422_s13  ;;  %v362_v19 = vmul.f32 0.5, %v1218_v13 }
 0x53e   :  { %v414_v15 = vadd.f32 %v1563_v35, %v411_v14 }
 0x53f   :  { %v363_v23 = vadd.f32 0.5, %v362_v19 }
 0x540   :  { %1219 = vtanh.f32 %v414_v15 }
 0x541   :  { %v412_v16 = vpop.f32.mrf.mxu2  ;;  %v364_v31 = vmul.f32 %v363_v23, %v239_v54 }
 0x543   :  { %v399_v17 = vpop.f32.mrf.mxu1 }
 0x546   :  { %v1220_v18 = vpop.eup %1219 }
 0x547   :  { %420 = vrot.lane.b32.xlu0 %v1220_v18, %s1422_s13  ;;  %v416_v27 = vmul.f32 0.5, %v1220_v18 }
 0x549   :  { %v417_v28 = vadd.f32 0.5, %v416_v27 }
 0x54b   :  { %v418_v36 = vmul.f32 %v417_v28, %v321_v59 }
 0x597   :  { %v367_v25 = vpop.permute.xlu2 %366 }
 0x598   :  { %v369_v26 = vmul.f32 %v367_v25, %v363_v23 }
 0x59a   :  { %371 = vrot.lane.b32.xlu1 %v369_v26, %s1431_s3 }
 0x5b9   :  { %v421_v29 = vpop.permute.xlu0 %420 }
 0x5ba   :  { %v423_v30 = vmul.f32 %v421_v29, %v417_v28 }
 0x5bc   :  { %425 = vrot.lane.b32.xlu2 %v423_v30, %s1431_s3 }
 0x60c   :  { %v372_v32 = vpop.permute.xlu1 %371 }
 0x60d   :  { %v374_v33 = vadd.f32 %v372_v32, %v364_v31 }
 0x60f   :  { %1221 = vtanh.f32 %v374_v33 }
 0x615   :  { %v1222_v34 = vpop.eup %1221 }
 0x616   :  { %v426_v37 = vpop.permute.xlu2 %425  ;;  %377 = vrot.lane.b32.xlu0 %v1222_v34, %s1422_s13 }
 0x617   :  { %v428_v38 = vadd.f32 %v426_v37, %v418_v36 }
 0x619   :  { %1223 = vtanh.f32 %v428_v38 }
 0x61f   :  { %v1224_v39 = vpop.eup %1223 }
 0x620   :  { %431 = vrot.lane.b32.xlu1 %v1224_v39, %s1422_s13 }
 0x688   :  { %v378_v40 = vpop.permute.xlu0 %377 }
 0x689   :  { %v380_v41 = vmul.f32 %v378_v40, %v363_v23 }
 0x68b   :  { %v444_v42 = vpack.c.bf16 %v380_v41, %v380_v41 }
 0x68d   :  { %446 = vrot.lane.b32.xlu2 %v444_v42, %s1431_s3 }
 0x692   :  { %v432_v43 = vpop.permute.xlu1 %431 }
 0x693   :  { %v1597_v44 = vmul.f32 %v432_v43, %v417_v28  ;;  %v126_v28 = vld [vmem:[#allocation5 + $0x20] sm:$0xff] }
 0x695   :  { %v485_v45 = vpack.c.bf16 %v1597_v44, %v1597_v44 }
 0x697   :  { %487 = vrot.lane.b32.xlu0 %v485_v45, %s1431_s3 }
 0x6e7   :  { %v447_v46 = vpop.permute.xlu2 %446 }
 0x6e8   :  { %1152 = vmatmul.msk.bf16.vlgmr.msrb.gmra.mxu3 %vm113_vm0, %v447_v46  ;;  %1154 = vmatmul.msk.bf16.vlgmr.msra.gmra.mxu1 %vm113_vm0, %v447_v46 }
 0x6e9   :  { %719 = vmatpush.bf16.msrb.mxu3 %v1532_v21  ;;  %810 = vmatpush.bf16.msra.mxu1 %v1530_v20 }
 0x6ed   :  { %720 = vmatpush.bf16.msrb.mxu3 %v1539_v24  ;;  %811 = vmatpush.bf16.msra.mxu1 %v1535_v22 }
 0x709   :  { %v488_v47 = vpop.permute.xlu0 %487 }
 0x70a   :  { %1153 = vmatmul.msk.bf16.vlgmr.msra.gmra.mxu0 %vm113_vm0, %v488_v47 }
 0x70b   :  { %769 = vmatpush.bf16.msra.mxu0 %v1512_v1 }
 0x70f   :  { %770 = vmatpush.bf16.msra.mxu0 %v1515_v2 }
 0x765   :  { %v514_v48 = vpop.f32.mrf.mxu1 }
 0x76b   :  { %v460_v50 = vpop.f32.mrf.mxu3 }
 0x76c   :  { %v464_v51 = vadd.f32 %v460_v50, %v125_v49 }
 0x76d   :  { %v516_v52 = vpop.f32.mrf.mxu1 }
 0x76e   :  { %1225 = vtanh.f32 %v464_v51 }
 0x773   :  { %v462_v53 = vpop.f32.mrf.mxu3 }
 0x774   :  { %v1226_v54 = vpop.eup %1225 }
 0x775   :  { %470 = vrot.lane.b32.xlu2 %v1226_v54, %s1422_s13  ;;  %v466_v60 = vmul.f32 0.5, %v1226_v54 }
 0x777   :  { %v467_v61 = vadd.f32 0.5, %v466_v60 }
 0x779   :  { %v468_v7 = vmul.f32 %v467_v61, %v374_v33 }
 0x787   :  { %v501_v55 = vpop.f32.mrf.mxu0 }
 0x788   :  { %v515_v56 = vadd.f32 %v514_v48, %v501_v55 }
 0x78a   :  { %v518_v57 = vadd.f32 %v1563_v35, %v515_v56 }
 0x78c   :  { %1227 = vtanh.f32 %v518_v57 }
 0x78f   :  { %v503_v58 = vpop.f32.mrf.mxu0 }
 0x792   :  { %v1228_v59 = vpop.eup %1227 }
 0x793   :  { %524 = vrot.lane.b32.xlu1 %v1228_v59, %s1422_s13  ;;  %v520_v0 = vmul.f32 0.5, %v1228_v59 }
 0x795   :  { %v521_v4 = vadd.f32 0.5, %v520_v0 }
 0x797   :  { %v522_v11 = vmul.f32 %v521_v4, %v428_v38 }
 0x7cf   :  { %v471_v62 = vpop.permute.xlu2 %470 }
 0x7d0   :  { %v473_v63 = vmul.f32 %v471_v62, %v467_v61 }
 0x7d2   :  { %475 = vrot.lane.b32.xlu1 %v473_v63, %s1431_s3  ;;  %v127_v63 = vld [vmem:[#allocation5 + $0x28] sm:$0xff] }
 0x805   :  { %v525_v5 = vpop.permute.xlu1 %524 }
 0x806   :  { %v527_v6 = vmul.f32 %v525_v5, %v521_v4 }
 0x808   :  { %529 = vrot.lane.b32.xlu0 %v527_v6, %s1431_s3 }
 0x844   :  { %v476_v8 = vpop.permute.xlu1 %475 }
 0x845   :  { %v478_v9 = vadd.f32 %v476_v8, %v468_v7 }
 0x847   :  { %1229 = vtanh.f32 %v478_v9 }
 0x84d   :  { %v1230_v10 = vpop.eup %1229 }
 0x84e   :  { %481 = vrot.lane.b32.xlu0 %v1230_v10, %s1422_s13 }
 0x87a   :  { %v530_v12 = vpop.permute.xlu0 %529 }
 0x87b   :  { %v532_v13 = vadd.f32 %v530_v12, %v522_v11 }
 0x87d   :  { %1231 = vtanh.f32 %v532_v13 }
 0x883   :  { %v1232_v14 = vpop.eup %1231 }
 0x884   :  { %535 = vrot.lane.b32.xlu2 %v1232_v14, %s1422_s13 }
 0x8c0   :  { %v482_v15 = vpop.permute.xlu0 %481 }
 0x8c1   :  { %v484_v16 = vmul.f32 %v482_v15, %v467_v61 }
 0x8c3   :  { %v548_v17 = vpack.c.bf16 %v484_v16, %v484_v16 }
 0x8c5   :  { %550 = vrot.lane.b32.xlu2 %v548_v17, %s1431_s3 }
 0x8de   :  { %v536_v18 = vpop.permute.xlu2 %535 }
 0x8df   :  { %v1619_v19 = vmul.f32 %v536_v18, %v521_v4 }
 0x8e1   :  { %v589_v23 = vpack.c.bf16 %v1619_v19, %v1619_v19 }
 0x8e3   :  { %591 = vrot.lane.b32.xlu1 %v589_v23, %s1431_s3 }
 0x91f   :  { %v551_v25 = vpop.permute.xlu2 %550 }
 0x920   :  { %1155 = vmatmul.msk.bf16.vlgmr.msra.gmra.mxu2 %vm113_vm0, %v551_v25  ;;  %1157 = vmatmul.msk.bf16.vlgmr.msrb.gmra.mxu0 %vm113_vm0, %v551_v25 }
 0x921   :  { %823 = vmatpush.bf16.msra.mxu2 %v1532_v21  ;;  %914 = vmatpush.bf16.msrb.mxu0 %v1530_v20 }
 0x925   :  { %824 = vmatpush.bf16.msra.mxu2 %v1539_v24  ;;  %915 = vmatpush.bf16.msrb.mxu0 %v1535_v22 }
 0x955   :  { %v592_v26 = vpop.permute.xlu1 %591 }
 0x956   :  { %1156 = vmatmul.msk.bf16.vlgmr.msra.gmra.mxu3 %vm113_vm0, %v592_v26 }
 0x957   :  { %873 = vmatpush.bf16.msra.mxu3 %v1512_v1 }
 0x95b   :  { %874 = vmatpush.bf16.msra.mxu3 %v1515_v2 }
 0x99d   :  { %v618_v27 = vpop.f32.mrf.mxu0 }
 0x9a3   :  { %v564_v29 = vpop.f32.mrf.mxu2 }
 0x9a4   :  { %v568_v30 = vadd.f32 %v564_v29, %v126_v28 }
 0x9a5   :  { %v620_v31 = vpop.f32.mrf.mxu0 }
 0x9a6   :  { %1233 = vtanh.f32 %v568_v30 }
 0x9ab   :  { %v566_v32 = vpop.f32.mrf.mxu2 }
 0x9ac   :  { %v1234_v33 = vpop.eup %1233 }
 0x9ad   :  { %574 = vrot.lane.b32.xlu0 %v1234_v33, %s1422_s13  ;;  %v570_v1 = vmul.f32 0.5, %v1234_v33 }
 0x9af   :  { %v571_v2 = vadd.f32 0.5, %v570_v1  ;;  %v128_v1 = vld [vmem:[#allocation5 + $0x30] sm:$0xff] }
 0x9b1   :  { %v572_v47 = vmul.f32 %v571_v2, %v478_v9 }
 0x9d9   :  { %v605_v34 = vpop.f32.mrf.mxu3 }
 0x9da   :  { %v619_v36 = vadd.f32 %v618_v27, %v605_v34 }
 0x9dc   :  { %v622_v37 = vadd.f32 %v1563_v35, %v619_v36 }
 0x9de   :  { %1235 = vtanh.f32 %v622_v37 }
 0x9e1   :  { %v607_v38 = vpop.f32.mrf.mxu3 }
 0x9e4   :  { %v1236_v39 = vpop.eup %1235 }
 0x9e5   :  { %628 = vrot.lane.b32.xlu1 %v1236_v39, %s1422_s13  ;;  %v624_v42 = vmul.f32 0.5, %v1236_v39 }
 0x9e7   :  { %v625_v43 = vadd.f32 0.5, %v624_v42 }
 0x9e9   :  { %v626_v51 = vmul.f32 %v625_v43, %v532_v13 }
 0xa1f   :  { %v575_v40 = vpop.permute.xlu0 %574 }
 0xa20   :  { %v577_v41 = vmul.f32 %v575_v40, %v571_v2 }
 0xa22   :  { %579 = vrot.lane.b32.xlu2 %v577_v41, %s1431_s3 }
 0xa57   :  { %v629_v45 = vpop.permute.xlu1 %628 }
 0xa58   :  { %v631_v46 = vmul.f32 %v629_v45, %v625_v43 }
 0xa5a   :  { %633 = vrot.lane.b32.xlu0 %v631_v46, %s1431_s3 }
 0xa7c   :  { %v580_v48 = vpop.permute.xlu2 %579 }
 0xa7d   :  { %v582_v49 = vadd.f32 %v580_v48, %v572_v47 }
 0xa7f   :  { %1237 = vtanh.f32 %v582_v49 }
 0xa85   :  { %v1238_v50 = vpop.eup %1237 }
 0xa86   :  { %585 = vrot.lane.b32.xlu1 %v1238_v50, %s1422_s13 }
 0xacc   :  { %v634_v52 = vpop.permute.xlu0 %633 }
 0xacd   :  { %v636_v53 = vadd.f32 %v634_v52, %v626_v51 }
 0xacf   :  { %1239 = vtanh.f32 %v636_v53 }
 0xad5   :  { %v1240_v54 = vpop.eup %1239 }
 0xad6   :  { %639 = vrot.lane.b32.xlu2 %v1240_v54, %s1422_s13 }
 0xaf8   :  { %v586_v55 = vpop.permute.xlu1 %585 }
 0xaf9   :  { %v588_v56 = vmul.f32 %v586_v55, %v571_v2 }
 0xafb   :  { %v652_v57 = vpack.c.bf16 %v588_v56, %v588_v56 }
 0xafd   :  { %654 = vrot.lane.b32.xlu0 %v652_v57, %s1431_s3 }
 0xb30   :  { %v640_v58 = vpop.permute.xlu2 %639 }
 0xb31   :  { %v1641_v59 = vmul.f32 %v640_v58, %v625_v43 }
 0xb33   :  { %v693_v60 = vpack.c.bf16 %v1641_v59, %v1641_v59 }
 0xb35   :  { %695 = vrot.lane.b32.xlu1 %v693_v60, %s1431_s3 }
 0xb6f   :  { %v655_v61 = vpop.permute.xlu0 %654 }
 0xb70   :  { %1158 = vmatmul.msk.bf16.vlgmr.msrb.gmra.mxu1 %vm113_vm0, %v655_v61  ;;  %1160 = vmatmul.msk.bf16.vlgmr.msrb.gmra.mxu3 %vm113_vm0, %v655_v61 }
 0xb71   :  { %927 = vmatpush.bf16.msrb.mxu1 %v1532_v21  ;;  %997 = vmatpush.bf16.msrb.mxu3 %v1532_v21 }
 0xb75   :  { %928 = vmatpush.bf16.msrb.mxu1 %v1539_v24  ;;  %998 = vmatpush.bf16.msrb.mxu3 %v1539_v24 }
 0xba7   :  { %v696_v62 = vpop.permute.xlu1 %695 }
 0xba8   :  { %1159 = vmatmul.msk.bf16.vlgmr.msrb.gmra.mxu2 %vm113_vm0, %v696_v62 }
 0xba9   :  { %978 = vmatpush.bf16.msrb.mxu2 %v1530_v20 }
 0xbad   :  { %979 = vmatpush.bf16.msrb.mxu2 %v1535_v22 }
 0xbed   :  { %v668_v0 = vpop.f32.mrf.mxu1 }
 0xbee   :  { %v672_v4 = vadd.f32 %v668_v0, %v127_v63 }
 0xbf0   :  { %1241 = vtanh.f32 %v672_v4 }
 0xbf3   :  { %v722_v5 = vpop.f32.mrf.mxu3 }
 0xbf5   :  { %v670_v6 = vpop.f32.mrf.mxu1 }
 0xbf6   :  { %v1242_v7 = vpop.eup %1241 }
 0xbf7   :  { %678 = vrot.lane.b32.xlu2 %v1242_v7, %s1422_s13  ;;  %v674_v20 = vmul.f32 0.5, %v1242_v7 }
 0xbf9   :  { %v675_v22 = vadd.f32 0.5, %v674_v20 }
 0xbfb   :  { %v724_v21 = vpop.f32.mrf.mxu3  ;;  %v676_v18 = vmul.f32 %v675_v22, %v582_v49 }
 0xc2b   :  { %v709_v8 = vpop.f32.mrf.mxu2 }
 0xc2c   :  { %v723_v9 = vadd.f32 %v722_v5, %v709_v8 }
 0xc2e   :  { %v726_v24 = vadd.f32 %v1563_v35, %v723_v9 }
 0xc30   :  { %1243 = vtanh.f32 %v726_v24 }
 0xc33   :  { %v711_v10 = vpop.f32.mrf.mxu2 }
 0xc36   :  { %v1244_v11 = vpop.eup %1243 }
 0xc37   :  { %732 = vrot.lane.b32.xlu0 %v1244_v11, %s1422_s13  ;;  %v728_v14 = vmul.f32 0.5, %v1244_v11 }
 0xc39   :  { %v729_v15 = vadd.f32 0.5, %v728_v14 }
 0xc3b   :  { %v730_v27 = vmul.f32 %v729_v15, %v636_v53 }
 0xc51   :  { %v679_v12 = vpop.permute.xlu2 %678 }
 0xc52   :  { %v681_v13 = vmul.f32 %v679_v12, %v675_v22  ;;  %v129_v12 = vld [vmem:[#allocation5 + $0x38] sm:$0xff] }
 0xc54   :  { %683 = vrot.lane.b32.xlu1 %v681_v13, %s1431_s3 }
 0xca9   :  { %v733_v16 = vpop.permute.xlu0 %732 }
 0xcaa   :  { %v735_v17 = vmul.f32 %v733_v16, %v729_v15 }
 0xcac   :  { %737 = vrot.lane.b32.xlu2 %v735_v17, %s1431_s3 }
 0xcc6   :  { %v684_v23 = vpop.permute.xlu1 %683 }
 0xcc7   :  { %v686_v25 = vadd.f32 %v684_v23, %v676_v18 }
 0xcc9   :  { %1245 = vtanh.f32 %v686_v25 }
 0xccf   :  { %v1246_v26 = vpop.eup %1245 }
 0xcd0   :  { %689 = vrot.lane.b32.xlu0 %v1246_v26, %s1422_s13 }
 0xd06   :  { %v738_v28 = vpop.permute.xlu2 %737 }
 0xd07   :  { %v740_v29 = vadd.f32 %v738_v28, %v730_v27 }
 0xd09   :  { %1247 = vtanh.f32 %v740_v29 }
 0xd0f   :  { %v1248_v30 = vpop.eup %1247 }
 0xd10   :  { %743 = vrot.lane.b32.xlu1 %v1248_v30, %s1422_s13 }
 0xd42   :  { %v690_v31 = vpop.permute.xlu0 %689 }
 0xd43   :  { %v692_v32 = vmul.f32 %v690_v31, %v675_v22 }
 0xd45   :  { %v756_v33 = vpack.c.bf16 %v692_v32, %v692_v32 }
 0xd47   :  { %758 = vrot.lane.b32.xlu2 %v756_v33, %s1431_s3 }
 0xd82   :  { %v744_v34 = vpop.permute.xlu1 %743 }
 0xd83   :  { %v1663_v36 = vmul.f32 %v744_v34, %v729_v15 }
 0xd85   :  { %v797_v37 = vpack.c.bf16 %v1663_v36, %v1663_v36 }
 0xd87   :  { %799 = vrot.lane.b32.xlu0 %v797_v37, %s1431_s3 }
 0xda1   :  { %v759_v38 = vpop.permute.xlu2 %758 }
 0xda2   :  { %1161 = vmatmul.msk.bf16.vlgmr.msra.gmra.mxu0 %vm113_vm0, %v759_v38  ;;  %1163 = vmatmul.msk.bf16.vlgmr.msra.gmra.mxu2 %vm113_vm0, %v759_v38 }
 0xdf9   :  { %v800_v39 = vpop.permute.xlu0 %799 }
 0xdfa   :  { %1162 = vmatmul.msk.bf16.vlgmr.msra.gmra.mxu1 %vm113_vm0, %v800_v39 }
 0xe1f   :  { %v772_v2 = vpop.f32.mrf.mxu0 }
 0xe20   :  { %v776_v40 = vadd.f32 %v772_v2, %v128_v1 }
 0xe22   :  { %1249 = vtanh.f32 %v776_v40 }
 0xe25   :  { %v826_v41 = vpop.f32.mrf.mxu2 }
 0xe27   :  { %v774_v42 = vpop.f32.mrf.mxu0 }
 0xe28   :  { %v1250_v43 = vpop.eup %1249 }
 0xe29   :  { %782 = vrot.lane.b32.xlu1 %v1250_v43, %s1422_s13  ;;  %v778_v51 = vmul.f32 0.5, %v1250_v43 }
 0xe2b   :  { %v779_v52 = vadd.f32 0.5, %v778_v51 }
 0xe2d   :  { %v828_v45 = vpop.f32.mrf.mxu2  ;;  %v780_v60 = vmul.f32 %v779_v52, %v686_v25 }
 0xe77   :  { %v813_v46 = vpop.f32.mrf.mxu1 }
 0xe78   :  { %v827_v47 = vadd.f32 %v826_v41, %v813_v46 }
 0xe7a   :  { %v830_v48 = vadd.f32 %v1563_v35, %v827_v47 }
 0xe7c   :  { %1251 = vtanh.f32 %v830_v48 }
 0xe7f   :  { %v815_v49 = vpop.f32.mrf.mxu1 }
 0xe82   :  { %v1252_v50 = vpop.eup %1251 }
 0xe83   :  { %836 = vrot.lane.b32.xlu2 %v1252_v50, %s1422_s13  ;;  %v832_v55 = vmul.f32 0.5, %v1252_v50 }
 0xe85   :  { %v833_v56 = vadd.f32 0.5, %v832_v55 }
 0xe87   :  { %v834_v0 = vmul.f32 %v833_v56, %v740_v29 }
 0xe9b   :  { %v783_v53 = vpop.permute.xlu1 %782 }
 0xe9c   :  { %v785_v54 = vmul.f32 %v783_v53, %v779_v52  ;;  %v120_v53 = vld [vmem:[%s1743_s0] sm:$0xff]  ;;  %s1433_s0 = smov 96  }
 0xe9d   :  { %v1120_v55 = vadd.s32 4294967295, %v120_v53 }
 0xe9e   :  { %787 = vrot.lane.b32.xlu0 %v785_v54, %s1431_s3  ;;  %v1432_v54 = vmov 0  }
 0xe9f   :  { %1200 = vset.pattern.permute.xlu1 %v1432_v54  ;;  %1202 = vset.pattern.permute.xlu2 %v1432_v54  ;;  %vm329_vm1 = vcmp.eq.s32.totalorder %v1120_v55, 0  ;;  %vm645_vm2 = vcmp.eq.s32.totalorder %v1120_v55, 3  ;;  %vm853_vm3 = vcmp.eq.s32.totalorder %v1120_v55, 5  ;;  %vm1027_vm4 = vcmp.eq.s32.totalorder %v1120_v55, 7 }
 0xea0   :  { %1201 = vset.pattern.permute.xlu0 %v1432_v54  ;;  %vm541_vm5 = vcmp.eq.s32.totalorder %v1120_v55, 2  ;;  %vm749_vm6 = vcmp.eq.s32.totalorder %v1120_v55, 4  ;;  %vm437_vm7 = vcmp.eq.s32.totalorder %v1120_v55, 1  ;;  %vm957_vm8 = vcmp.eq.s32.totalorder %v1120_v55, 6 }
 0xedd   :  { %v837_v57 = vpop.permute.xlu2 %836 }
 0xede   :  { %v839_v58 = vmul.f32 %v837_v57, %v833_v56 }
 0xee0   :  { %841 = vrot.lane.b32.xlu1 %v839_v58, %s1431_s3 }
 0xf10   :  { %v788_v61 = vpop.permute.xlu0 %787 }
 0xf11   :  { %v790_v62 = vadd.f32 %v788_v61, %v780_v60 }
 0xf13   :  { %1253 = vtanh.f32 %v790_v62 }
 0xf19   :  { %v1254_v63 = vpop.eup %1253 }
 0xf1a   :  { %793 = vrot.lane.b32.xlu2 %v1254_v63, %s1422_s13 }
 0xf52   :  { %v842_v4 = vpop.permute.xlu1 %841 }
 0xf53   :  { %v844_v5 = vadd.f32 %v842_v4, %v834_v0  ;;  %v149_v4 = vld [vmem:[#allocation4] sm:$0xff] }
 0xf55   :  { %1255 = vtanh.f32 %v844_v5 }
 0xf5b   :  { %v1256_v6 = vpop.eup %1255 }
 0xf5c   :  { %847 = vrot.lane.b32.xlu0 %v1256_v6, %s1422_s13  ;;  %v854_v6 = vsel %vm853_vm3, 1, %v1432_v54 }
 0xf74   :  { %v794_v7 = vpop.permute.xlu2 %793 }
 0xf75   :  { %v796_v21 = vmul.f32 %v794_v7, %v779_v52  ;;  %v1028_v7 = vsel %vm1027_vm4, 1, %v1432_v54 }
 0xf77   :  { %v860_v8 = vpack.c.bf16 %v796_v21, %v796_v21  ;;  %v750_v21 = vsel %vm749_vm6, 1, %v1432_v54 }
 0xf79   :  { %862 = vrot.lane.b32.xlu1 %v860_v8, %s1431_s3 }
 0xfce   :  { %v848_v9 = vpop.permute.xlu0 %847 }
 0xfcf   :  { %v1679_v24 = vmul.f32 %v848_v9, %v833_v56  ;;  %v330_v56 = vsel %vm329_vm1, 1, %v1432_v54 }
 0xfd1   :  { %v901_v10 = vpack.c.bf16 %v1679_v24, %v1679_v24 }
 0xfd3   :  { %903 = vrot.lane.b32.xlu2 %v901_v10, %s1431_s3 }
 0xfeb   :  { %v863_v11 = vpop.permute.xlu1 %862 }
 0xfec   :  { %1164 = vmatmul.msk.bf16.vlgmr.msra.gmra.mxu3 %vm113_vm0, %v863_v11  ;;  %1166 = vmatmul.msk.bf16.vlgmr.msrb.gmra.mxu1 %vm113_vm0, %v863_v11 }
0x102d   :  { %v904_v20 = vpop.permute.xlu2 %903 }
0x102e   :  { %1165 = vmatmul.msk.bf16.vlgmr.msrb.gmra.mxu0 %vm113_vm0, %v904_v20 }
0x1069   :  { %v930_v22 = vpop.f32.mrf.mxu1 }
0x106f   :  { %v876_v13 = vpop.f32.mrf.mxu3 }
0x1070   :  { %v880_v14 = vadd.f32 %v876_v13, %v129_v12  ;;  %v958_v13 = vsel %vm957_vm8, 1, %v1432_v54 }
0x1071   :  { %v932_v15 = vpop.f32.mrf.mxu1 }
0x1072   :  { %1257 = vtanh.f32 %v880_v14 }
0x1077   :  { %v878_v16 = vpop.f32.mrf.mxu3 }
0x1078   :  { %v1258_v17 = vpop.eup %1257 }
0x1079   :  { %886 = vrot.lane.b32.xlu0 %v1258_v17, %s1422_s13  ;;  %v882_v28 = vmul.f32 0.5, %v1258_v17 }
0x107b   :  { %v883_v29 = vadd.f32 0.5, %v882_v28 }
0x107d   :  { %v884_v38 = vmul.f32 %v883_v29, %v790_v62 }
0x10ab   :  { %v917_v18 = vpop.f32.mrf.mxu0 }
0x10ac   :  { %v931_v23 = vadd.f32 %v930_v22, %v917_v18  ;;  %v438_v22 = vsel %vm437_vm7, 1, %v1432_v54 }
0x10ae   :  { %v934_v25 = vadd.f32 %v1563_v35, %v931_v23 }
0x10b0   :  { %1259 = vtanh.f32 %v934_v25 }
0x10b3   :  { %v919_v26 = vpop.f32.mrf.mxu0 }
0x10b6   :  { %v1260_v27 = vpop.eup %1259 }
0x10b7   :  { %940 = vrot.lane.b32.xlu1 %v1260_v27, %s1422_s13  ;;  %v936_v32 = vmul.f32 0.5, %v1260_v27 }
0x10b9   :  { %v937_v33 = vadd.f32 0.5, %v936_v32 }
0x10bb   :  { %v938_v40 = vmul.f32 %v937_v33, %v844_v5  ;;  %v646_v5 = vsel %vm645_vm2, 1, %v1432_v54 }
0x10eb   :  { %v887_v30 = vpop.permute.xlu0 %886 }
0x10ec   :  { %v889_v31 = vmul.f32 %v887_v30, %v883_v29 }
0x10ee   :  { %891 = vrot.lane.b32.xlu2 %v889_v31, %s1431_s3 }
0x1129   :  { %v941_v34 = vpop.permute.xlu1 %940 }
0x112a   :  { %v943_v37 = vmul.f32 %v941_v34, %v937_v33 }
0x112c   :  { %945 = vrot.lane.b32.xlu0 %v943_v37, %s1431_s3 }
0x1148   :  { %v892_v39 = vpop.permute.xlu2 %891 }
0x1149   :  { %v894_v1 = vadd.f32 %v892_v39, %v884_v38 }
0x114b   :  { %1261 = vtanh.f32 %v894_v1 }
0x1151   :  { %v1262_v2 = vpop.eup %1261 }
0x1152   :  { %897 = vrot.lane.b32.xlu1 %v1262_v2, %s1422_s13 }
0x119e   :  { %v946_v41 = vpop.permute.xlu0 %945 }
0x119f   :  { %v1693_v42 = vadd.f32 %v946_v41, %v938_v40 }
0x11a1   :  { %1263 = vtanh.f32 %v1693_v42 }
0x11a7   :  { %v1264_v43 = vpop.eup %1263 }
0x11a8   :  { %951 = vrot.lane.b32.xlu2 %v1264_v43, %s1422_s13  ;;  %v1204_v43 = vld [vmem:[%s1750_s7] ss:$0 sm:$0xff] }
0x11c4   :  { %v898_v45 = vpop.permute.xlu1 %897 }
0x11c5   :  { %v1697_v46 = vmul.f32 %v898_v45, %v883_v29 }
0x11c7   :  { %v964_v47 = vpack.c.bf16 %v1697_v46, %v1697_v46 }
0x11c9   :  { %986 = vrot.lane.b32.xlu1 %v964_v47, %s1431_s3 }
0x11d1   :  { %332 = vperm.xlu1 %1200, %v330_v56  }
0x1202   :  { %v952_v48 = vpop.permute.xlu2 %951 }
0x1203   :  { %v1702_v49 = vmul.f32 %v952_v48, %v937_v33 }
0x1205   :  { %v965_v50 = vpack.c.bf16 %v1702_v49, %v1702_v49 }
0x1207   :  { %967 = vrot.lane.b32.xlu0 %v965_v50, %s1431_s3 }
0x123b   :  { %v987_v51 = vpop.permute.xlu1 %986 }
0x123c   :  { %1168 = vmatmul.msk.bf16.vlgmr.msrb.gmra.mxu3 %vm113_vm0, %v987_v51 }
0x1243   :  { %v333_v17 = vpop.permute.xlu1 %332 }
0x1244   :  { %vm334_vm9 = vcmp.eq.s32.totalorder %v333_v17, 1 }
0x1279   :  { %v968_v52 = vpop.permute.xlu0 %967 }
0x127a   :  { %1167 = vmatmul.msk.bf16.vlgmr.msrb.gmra.mxu2 %vm113_vm0, %v968_v52 }
0x12bf   :  { %v1000_v57 = vpop.f32.mrf.mxu3 }
0x12c7   :  { %v1002_v58 = vpop.f32.mrf.mxu3 }
0x12fd   :  { %v981_v60 = vpop.f32.mrf.mxu2 }
0x12fe   :  { %v1001_v61 = vadd.f32 %v1000_v57, %v981_v60 }
0x1300   :  { %v1004_v62 = vadd.f32 %v1563_v35, %v1001_v61  ;;  %v542_v35 = vsel %vm541_vm5, 1, %v1432_v54 }
0x1301   :  { %544 = vperm.xlu1 %1200, %v542_v35  }
0x1302   :  { %1265 = vtanh.f32 %v1004_v62 }
0x1305   :  { %v983_v63 = vpop.f32.mrf.mxu2 }
0x1308   :  { %v1266_v0 = vpop.eup %1265 }
0x1309   :  { %1010 = vrot.lane.b32.xlu2 %v1266_v0, %s1422_s13  ;;  %752 = vperm.xlu1 %1200, %v750_v21   ;;  %v1006_v8 = vmul.f32 0.5, %v1266_v0 }
0x130b   :  { %v1007_v9 = vadd.f32 0.5, %v1006_v8 }
0x130d   :  { %v1008_v23 = vmul.f32 %v1007_v9, %v1693_v42 }
0x1311   :  { %336 = vrot.lane.b32.xlu2 %v149_v4, %s1433_s0 }
0x1319   :  { %648 = vperm.xlu2 %1202, %v646_v5  }
0x1321   :  { %856 = vperm.xlu2 %1202, %v854_v6  }
0x1329   :  { %1030 = vperm.xlu2 %1202, %v1028_v7  }
0x1331   :  { %1040 = vrot.lane.b32.xlu2 %v894_v1, %s1433_s0 }
0x1363   :  { %v1011_v10 = vpop.permute.xlu2 %1010 }
0x1364   :  { %v1013_v11 = vmul.f32 %v1011_v10, %v1007_v9 }
0x1366   :  { %1015 = vrot.lane.b32.xlu0 %v1013_v11, %s1431_s3 }
0x136b   :  { %v337_v20 = vpop.permute.xlu2 %336 }
0x136c   :  { %v339_v30 = vsel %vm334_vm9, %v1575_v3, %v337_v20  ;;  %v1185_v3 = vld [vmem:[#allocation13 + $0x8] sm:$0xff] }
0x136d   :  { %1093 = vmatpush.bf16.msra.mxu0 %v1185_v3 }
0x136e   :  { %440 = vperm.xlu0 %1201, %v438_v22  }
0x1373   :  { %v649_v12 = vpop.permute.xlu2 %648  ;;  %v545_v18 = vpop.permute.xlu1 %544 }
0x1374   :  { %vm546_vm10 = vcmp.eq.s32.totalorder %v545_v18, 1  ;;  %vm650_vm11 = vcmp.eq.s32.totalorder %v649_v12, 1 }
0x1376   :  { %960 = vperm.xlu0 %1201, %v958_v13  }
0x137b   :  { %v857_v14 = vpop.permute.xlu2 %856  ;;  %v753_v27 = vpop.permute.xlu1 %752 }
0x137c   :  { %vm754_vm13 = vcmp.eq.s32.totalorder %v753_v27, 1  ;;  %vm858_vm14 = vcmp.eq.s32.totalorder %v857_v14, 1 }
0x1383   :  { %v1031_v15 = vpop.permute.xlu2 %1030 }
0x1384   :  { %vm1032_vm1 = vcmp.eq.s32.totalorder %v1031_v15, 1 }
0x138b   :  { %v1041_v16 = vpop.permute.xlu2 %1040 }
0x138c   :  { %1043 = vst.msk [vmem:[#allocation3] sm:$0xff] %vm113_vm0, %v1041_v16 }
0x13d8   :  { %v1016_v25 = vpop.permute.xlu0 %1015 }
0x13d9   :  { %v1018_v26 = vadd.f32 %v1016_v25, %v1008_v23 }
0x13db   :  { %1267 = vtanh.f32 %v1018_v26 }
0x13e0   :  { %v441_v28 = vpop.permute.xlu0 %440 }
0x13e1   :  { %v1268_v29 = vpop.eup %1267  ;;  %vm442_vm12 = vcmp.eq.s32.totalorder %v441_v28, 1 }
0x13e2   :  { %v443_v31 = vsel %vm442_vm12, %v1597_v44, %v339_v30  ;;  %1021 = vrot.lane.b32.xlu1 %v1268_v29, %s1422_s13  ;;  %s1434_s13 = smov [#allocation14]  }
0x13e3   :  { %v547_v32 = vsel %vm546_vm10, %v1619_v19, %v443_v31  ;;  %s1106_s14 = sshll.u32 %s1434_s13, 4  ;;  %s1107_s14 = int_to_ptr.vmem [resolvable:$true] %s1106_s14 }
0x13e4   :  { %v651_v33 = vsel %vm650_vm11, %v1641_v59, %v547_v32 }
0x13e5   :  { %v755_v34 = vsel %vm754_vm13, %v1663_v36, %v651_v33 }
0x13e6   :  { %v859_v37 = vsel %vm858_vm14, %v1679_v24, %v755_v34  ;;  %v1184_v24 = vld [vmem:[#allocation13] sm:$0xff] }
0x13e7   :  { %1094 = vmatpush.bf16.msra.mxu0 %v1184_v24 }
0x13e8   :  { %v961_v44 = vpop.permute.xlu0 %960 }
0x13e9   :  { %vm962_vm15 = vcmp.eq.s32.totalorder %v961_v44, 1 }
0x13ea   :  { %1035 = vrot.lane.b32.xlu1 %v1697_v46, %s1431_s3  ;;  %v963_v19 = vsel %vm962_vm15, %v1702_v49, %v859_v37 }
0x13f2   :  { %1050 = vrot.lane.b32.xlu1 %v1018_v26, %s1433_s0 }
0x1454   :  { %v1022_v38 = vpop.permute.xlu1 %1021 }
0x1455   :  { %v1024_v39 = vmul.f32 %v1022_v38, %v1007_v9 }
0x1457   :  { %v1033_v1 = vsel %vm1032_vm1, %v1024_v39, %v963_v19 }
0x1458   :  { %1055 = vrot.lane.b32.xlu0 %v1033_v1, %s1431_s3 }
0x145c   :  { %v1036_v59 = vpop.permute.xlu1 %1035 }
0x145d   :  { %1038 = vst.msk [vmem:[#allocation2] sm:$0xff] %vm113_vm0, %v1036_v59 }
0x1460   :  { %1045 = vrot.lane.b32.xlu0 %v1024_v39, %s1431_s3 }
0x1464   :  { %v1051_v36 = vpop.permute.xlu1 %1050 }
0x1465   :  { %1053 = vst.msk [vmem:[#allocation3 + $0x8] sm:$0xff] %vm113_vm0, %v1051_v36 }
0x14ca   :  { %v1056_v2 = vpop.permute.xlu0 %1055 }
0x14cb   :  { %1058 = vst.msk [vmem:[#allocation4] sm:$0xff] %vm113_vm0, %v1056_v2 }
0x14d2   :  { %v1046_v40 = vpop.permute.xlu0 %1045  ;;  %v1062_v41 = vld [vmem:[#allocation4] sm:$0xff] }
0x14d3   :  { %1048 = vst.msk [vmem:[#allocation2 + $0x8] sm:$0xff] %vm113_vm0, %v1046_v40  ;;  %v1063_v42 = vpack.c.bf16 %v1062_v41, %v1062_v41 }
0x14d5   :  { %1177 = vmatmul.msk.bf16.vlgmr.msra.gmra.mxu0 %vm113_vm0, %v1063_v42 }
0x1552   :  { %v1096_v45 = vpop.f32.mrf.mxu0 }
0x1553   :  { %v1097_v46 = vadd.f32 %v1204_v43, %v1096_v45 }
0x1555   :  { %1100 = vst [vmem:[#allocation14] sm:$0xff] %v1097_v46 }
0x1556   :  { %1111 = dma.vmem_to_hbm [thread:$0]  %s1107_s14, 128, %s1109_s17, [#allocation7]  }
0x155a   :  { %v1098_v47 = vpop.f32.mrf.mxu0 }
0x155b   :  { %1419 = dma.done.wait [#allocation7], 128  }
0x155c   :  { %1420 = vsyncadd [#allocation7], 4294967168 }
0x155d   :  { %1116 = vsyncpa [#allocation6], 1 }
0x155e   :  { %1117 = vsyncpa [#allocation9], 1 }
0x155f   :  { %1118 = vsyncpa [#allocation12], 1 }
0x1560   :  { %1119 = vsyncpa [#allocation7], 1 }

</bundles_post_ra>
